<compile_context>
chip_gen: v7x
topology: tpu7x:2x2x1
jax: 0.10.0
libtpu: 0.0.40
codegen_flags: <defaults>
</compile_context>

<pallas_src>
import functools
import math

import jax
import jax.numpy as jnp
from jax import lax
from jax.experimental import pallas as pl
from jax.experimental.pallas import tpu as pltpu


def _flash_qkv_kernel(q_ref, k_ref, v_ref, o_ref,
                      m_ref, l_ref, acc_ref, qs_ref,
                      *, scale, mxu_dtype, seq_len, needs_mask):
    """One (head-block, q-tile, kv-tile) step of online-softmax attention.

    q_ref:   (B, C, TQ)   queries
    k_ref:   (B, C, TKV)  keys
    v_ref:   (B, C, TKV)  values
    o_ref:   (B, C, TQ)   output tile (written on the last kv step)
    m_ref:   (B, 1, TQ)   running row max          (f32 scratch)
    l_ref:   (B, 1, TQ)   running sum of exp       (f32 scratch)
    acc_ref: (B, C, TQ)   running weighted sum     (f32 scratch)
    qs_ref:  (B, C, TQ)   scaled, MXU-dtype queries (staged once per (i, j))
    """
    kv_idx = pl.program_id(2)

    # q block is resident across the whole kv axis: scale + cast it exactly once.
    @pl.when(kv_idx == 0)
    def _stage_q():
        qs_ref[...] = (q_ref[...] * scale).astype(mxu_dtype)

    q = qs_ref[...]
    k = k_ref[...].astype(mxu_dtype)
    v = v_ref[...].astype(mxu_dtype)

    # scores[b, s, t] = sum_c k[b, c, s] * q[b, c, t]   -> (B, TKV, TQ), f32 acc.
    s = lax.dot_general(
        k, q,
        dimension_numbers=(((1,), (1,)), ((0,), (0,))),
        preferred_element_type=jnp.float32)

    if needs_mask:
        tkv = s.shape[1]
        key_pos = kv_idx * tkv + lax.broadcasted_iota(jnp.int32, s.shape, 1)
        s = jnp.where(key_pos < seq_len, s, -1e30)

    tile_max = jnp.max(s, axis=1, keepdims=True)                 # (B, 1, TQ)

    @pl.when(kv_idx == 0)
    def _first_step():
        # No alpha rescale of zeros, no exp(-inf - m) on the first kv tile.
        p = jnp.exp(s - tile_max)                                # f32
        l_ref[...] = jnp.sum(p, axis=1, keepdims=True)
        acc_ref[...] = lax.dot_general(
            v, p.astype(mxu_dtype),
            dimension_numbers=(((2,), (1,)), ((0,), (0,))),
            preferred_element_type=jnp.float32)                  # (B, C, TQ)
        m_ref[...] = tile_max

    @pl.when(kv_idx > 0)
    def _online_update():
        m_prev = m_ref[...]
        m_new = jnp.maximum(m_prev, tile_max)
        alpha = jnp.exp(m_prev - m_new)                          # (B, 1, TQ)
        p = jnp.exp(s - m_new)                                   # (B, TKV, TQ) f32
        l_ref[...] = alpha * l_ref[...] + jnp.sum(p, axis=1, keepdims=True)
        pv = lax.dot_general(
            v, p.astype(mxu_dtype),
            dimension_numbers=(((2,), (1,)), ((0,), (0,))),
            preferred_element_type=jnp.float32)
        acc_ref[...] = alpha * acc_ref[...] + pv
        m_ref[...] = m_new

    @pl.when(kv_idx == pl.num_programs(2) - 1)
    def _finalize():
        inv_l = pl.reciprocal(l_ref[...], approx=False)
        o_ref[...] = (acc_ref[...] * inv_l).astype(o_ref.dtype)


def _estimate_vmem_bytes(b_blk, ch, tq, tkv, in_itemsize, mxu_itemsize):
    """Rough per-step VMEM footprint: double-buffered I/O + scratch + temporaries."""
    io = 2 * in_itemsize * b_blk * ch * (2 * tq + 2 * tkv)        # q,k,v,out blocks, 2 bufs
    scratch = 4 * b_blk * tq * (ch + 2)                           # acc, m, l (f32)
    scratch += mxu_itemsize * b_blk * ch * tq                     # staged scaled q
    temps = b_blk * tq * tkv * (2 * 4 + mxu_itemsize)             # s, p (f32) + p cast
    temps += mxu_itemsize * b_blk * ch * (tq + 2 * tkv)           # casted q/k/v operands
    return io + scratch + temps


def _choose_tiling(b, ch, t, in_itemsize, mxu_itemsize, budget):
    """Largest lane-dense tiles / heads-per-step that fit the VMEM budget."""
    tiles = [c for c in (512, 256, 128) if t % c == 0] or [t]
    blks = [d for d in (8, 4, 2, 1) if b % d == 0]
    for tile in tiles:
        for blk in blks:
            if _estimate_vmem_bytes(blk, ch, tile, tile, in_itemsize, mxu_itemsize) <= budget:
                return tile, tile, blk
    return tiles[-1], tiles[-1], blks[-1]


def qkv_attention(qkv, n_heads, *, q_tile=None, kv_tile=None, head_block=None,
                  mxu_dtype=None):
    """Packed multi-head attention: qkv [N, H*3*C, T] -> [N, H*C, T].

    Per head: out = softmax(q^T k / sqrt(C)) applied to v (legacy QKV attention
    semantics used by the UNet attention blocks).
    """
    bs, width, length = qkv.shape
    assert width % (3 * n_heads) == 0
    ch = width // (3 * n_heads)
    assert ch % 8 == 0, "head channels should be a multiple of the sublane pack"
    b = bs * n_heads

    if mxu_dtype is None:
        # Feed the MXU in bf16 when the model runs in f32 (accumulation stays f32).
        mxu_dtype = jnp.bfloat16 if qkv.dtype == jnp.float32 else qkv.dtype
    mxu_dtype = jnp.dtype(mxu_dtype)

    # Pad tokens up to a multiple of 128 (lane-dense tiles); padded keys are
    # masked inside the kernel, padded query outputs are sliced off below.
    t_pad = ((length + 127) // 128) * 128
    qkv_p = qkv if t_pad == length else jnp.pad(
        qkv, ((0, 0), (0, 0), (0, t_pad - length)))

    in_bytes = jnp.dtype(qkv.dtype).itemsize
    mxu_bytes = mxu_dtype.itemsize
    budget = 36 * 1024 * 1024
    tq_d, tkv_d, blk_d = _choose_tiling(b, ch, t_pad, in_bytes, mxu_bytes, budget)
    tq = q_tile or tq_d
    tkv = kv_tile or tkv_d
    b_blk = head_block or blk_d
    assert t_pad % tq == 0 and t_pad % tkv == 0 and b % b_blk == 0

    est = _estimate_vmem_bytes(b_blk, ch, tq, tkv, in_bytes, mxu_bytes)
    vmem_limit = int(min(max(2 * est, 32 * 1024 * 1024), 64 * 1024 * 1024))

    # (b, 3, ch, T): each of q/k/v starts at channel offset 0 of its own axis,
    # so every operand arrives as its own aligned block DMA (same slab passed
    # three times, selected by the block index on the size-3 axis).
    qkv_r = qkv_p.reshape(b, 3, ch, t_pad)

    grid = (b // b_blk, t_pad // tq, t_pad // tkv)
    scale = 1.0 / math.sqrt(ch)   # == C^-0.25 applied to both q and k

    kernel = functools.partial(
        _flash_qkv_kernel, scale=scale, mxu_dtype=mxu_dtype,
        seq_len=length, needs_mask=(t_pad != length))

    out = pl.pallas_call(
        kernel,
        out_shape=jax.ShapeDtypeStruct((b, ch, t_pad), qkv.dtype),
        grid_spec=pltpu.PrefetchScalarGridSpec(
            num_scalar_prefetch=0,
            grid=grid,
            in_specs=[
                pl.BlockSpec((b_blk, None, ch, tq), lambda i, j, k: (i, 0, 0, j)),   # Q
                pl.BlockSpec((b_blk, None, ch, tkv), lambda i, j, k: (i, 1, 0, k)),  # K
                pl.BlockSpec((b_blk, None, ch, tkv), lambda i, j, k: (i, 2, 0, k)),  # V
            ],
            out_specs=pl.BlockSpec((b_blk, ch, tq), lambda i, j, k: (i, 0, j)),
            scratch_shapes=[
                pltpu.VMEM((b_blk, 1, tq), jnp.float32),     # m (running max)
                pltpu.VMEM((b_blk, 1, tq), jnp.float32),     # l (running sum)
                pltpu.VMEM((b_blk, ch, tq), jnp.float32),    # acc
                pltpu.VMEM((b_blk, ch, tq), mxu_dtype),      # staged scaled q
            ],
        ),
        compiler_params=pltpu.CompilerParams(
            dimension_semantics=("parallel", "parallel", "arbitrary"),
            vmem_limit_bytes=vmem_limit,
        ),
    )(qkv_r, qkv_r, qkv_r)

    out = out.reshape(bs, n_heads * ch, t_pad)
    if t_pad != length:
        out = out[..., :length]
    return out


def _reference(qkv, n_heads):
    """Pure-JAX mirror of the PyTorch QKV attention, for verification."""
    bs, width, length = qkv.shape
    ch = width // (3 * n_heads)
    x = qkv.reshape(bs * n_heads, 3 * ch, length)
    q, k, v = x[:, :ch], x[:, ch:2 * ch], x[:, 2 * ch:]
    scale = 1.0 / math.sqrt(math.sqrt(ch))
    w = jnp.einsum('bct,bcs->bts', q * scale, k * scale,
                   precision=jax.lax.Precision.HIGHEST)
    w = jax.nn.softmax(w.astype(jnp.float32), axis=-1).astype(qkv.dtype)
    a = jnp.einsum('bts,bcs->bct', w, v, precision=jax.lax.Precision.HIGHEST)
    return a.reshape(bs, -1, length)


if __name__ == "__main__":
    # Shapes implied by AttentionBlock_trans: tokens T = h*w, inner_dim = heads*head_ch.
    # batch=2, heads=2, head_channels=32, h=w=16 -> T=256 tokens.
    n, n_heads, ch, hw = 2, 2, 32, 16
    t = hw * hw
    width = n_heads * 3 * ch

    key = jax.random.PRNGKey(0)
    qkv = jax.random.normal(key, (n, width, t), dtype=jnp.float32)
    ref = _reference(qkv, n_heads)

    # 1) exact (f32-MXU) path with 128 tiles so the multi-step online-softmax
    #    path is exercised; tight tolerance verifies the algorithm.
    out_f32 = jax.block_until_ready(
        qkv_attention(qkv, n_heads, q_tile=128, kv_tile=128, mxu_dtype=jnp.float32))
    assert out_f32.shape == (n, n_heads * ch, t)
    err = float(jnp.max(jnp.abs(out_f32 - ref)))
    assert err < 1e-4, f"f32-MXU path max abs err {err}"

    # 2) default perf path (bf16 MXU feed, auto tiles); looser tolerance.
    out_bf = jax.block_until_ready(qkv_attention(qkv, n_heads))
    err_bf = float(jnp.max(jnp.abs(out_bf - ref)))
    mean_bf = float(jnp.mean(jnp.abs(out_bf - ref)))
    assert err_bf < 1e-1 and mean_bf < 5e-3, \
        f"bf16-MXU path errs max={err_bf} mean={mean_bf}"

    # 3) non-128-multiple token count exercises the padding + key-mask path.
    t2 = 18 * 18   # 324 -> padded to 384
    qkv2 = jax.random.normal(jax.random.PRNGKey(1), (n, width, t2), dtype=jnp.float32)
    ref2 = _reference(qkv2, n_heads)
    out2 = jax.block_until_ready(
        qkv_attention(qkv2, n_heads, mxu_dtype=jnp.float32))
    assert out2.shape == (n, n_heads * ch, t2)
    err2 = float(jnp.max(jnp.abs(out2 - ref2)))
    assert err2 < 1e-4, f"padded f32-MXU path max abs err {err2}"

    print("KERNEL_OK")
</pallas_src>

<mosaic_0001>
module attributes {stable_mosaic.version = 11 : i64} {
  func.func @_flash_qkv_kernel(%arg0: i32, %arg1: i32, %arg2: i32, %arg3: memref<4x1x32x128xf32, #tpu.memory_space<vmem>>, %arg4: memref<4x1x32x128xf32, #tpu.memory_space<vmem>>, %arg5: memref<4x1x32x128xf32, #tpu.memory_space<vmem>>, %arg6: memref<4x32x128xf32, #tpu.memory_space<vmem>>, %arg7: memref<4x1x128xf32, #tpu.memory_space<vmem>>, %arg8: memref<4x1x128xf32, #tpu.memory_space<vmem>>, %arg9: memref<4x32x128xf32, #tpu.memory_space<vmem>>, %arg10: memref<4x32x128xf32, #tpu.memory_space<vmem>>) attributes {dimension_semantics = [#tpu.dimension_semantics<parallel>, #tpu.dimension_semantics<parallel>, #tpu.dimension_semantics<arbitrary>], iteration_bounds = array<i64: 1, 2, 2>, scalar_prefetch = 0 : i64, scratch_operands = 4 : i64, tpu.core_type = #tpu.core_type<tc>, window_params = [{transform_indices = @transform_0, window_bounds = array<i64: 4, 1, 32, 128>}, {transform_indices = @transform_1, window_bounds = array<i64: 4, 1, 32, 128>}, {transform_indices = @transform_2, window_bounds = array<i64: 4, 1, 32, 128>}, {transform_indices = @transform_3, window_bounds = array<i64: 4, 32, 128>}]} {
    %c0_i32 = arith.constant 0 : i32
    %0 = arith.cmpi eq, %arg2, %c0_i32 : i32
    %1 = arith.extui %0 : i1 to i32
    %c0_i32_0 = arith.constant 0 : i32
    %2 = arith.cmpi ne, %1, %c0_i32_0 : i32
    scf.if %2 {
      %c0_17 = arith.constant 0 : index
      %c0_18 = arith.constant 0 : index
      %c0_19 = arith.constant 0 : index
      %c0_20 = arith.constant 0 : index
      %20 = vector.load %arg3[%c0_17, %c0_18, %c0_19, %c0_20] : memref<4x1x32x128xf32, #tpu.memory_space<vmem>>, vector<4x1x32x128xf32>
      %21 = vector.shape_cast %20 : vector<4x1x32x128xf32> to vector<4x32x128xf32>
      %cst_21 = arith.constant 0.176776692 : f32
      %22 = vector.broadcast %cst_21 : f32 to vector<4x32x128xf32>
      %23 = arith.mulf %21, %22 : vector<4x32x128xf32>
      %c0_22 = arith.constant 0 : index
      %c0_23 = arith.constant 0 : index
      %c0_24 = arith.constant 0 : index
      %24 = vector.load %arg10[%c0_22, %c0_23, %c0_24] : memref<4x32x128xf32, #tpu.memory_space<vmem>>, vector<4x32x128xf32>
      tpu.vector_store %arg10[%c0_22, %c0_23, %c0_24], %23 {strides = array<i32>} : memref<4x32x128xf32, #tpu.memory_space<vmem>>, vector<4x32x128xf32>,
    } else {
    }
    %c0 = arith.constant 0 : index
    %c0_1 = arith.constant 0 : index
    %c0_2 = arith.constant 0 : index
    %3 = vector.load %arg10[%c0, %c0_1, %c0_2] : memref<4x32x128xf32, #tpu.memory_space<vmem>>, vector<4x32x128xf32>
    %c0_3 = arith.constant 0 : index
    %c0_4 = arith.constant 0 : index
    %c0_5 = arith.constant 0 : index
    %c0_6 = arith.constant 0 : index
    %4 = vector.load %arg4[%c0_3, %c0_4, %c0_5, %c0_6] : memref<4x1x32x128xf32, #tpu.memory_space<vmem>>, vector<4x1x32x128xf32>
    %5 = vector.shape_cast %4 : vector<4x1x32x128xf32> to vector<4x32x128xf32>
    %c0_7 = arith.constant 0 : index
    %c0_8 = arith.constant 0 : index
    %c0_9 = arith.constant 0 : index
    %c0_10 = arith.constant 0 : index
    %6 = vector.load %arg5[%c0_7, %c0_8, %c0_9, %c0_10] : memref<4x1x32x128xf32, #tpu.memory_space<vmem>>, vector<4x1x32x128xf32>
    %7 = vector.shape_cast %6 : vector<4x1x32x128xf32> to vector<4x32x128xf32>
    %cst = arith.constant dense<0.000000e+00> : vector<4x128x128xf32>
    %8 = tpu.matmul %5, %3, %cst {dimension_numbers = #tpu.dot_dimension_numbers<[1], [1], [2], [2], [0, 0, 0, 2, 1, 2], [0], [0]>} : vector<4x32x128xf32>, vector<4x32x128xf32>, vector<4x128x128xf32> -> vector<4x128x128xf32>
    %cst_11 = arith.constant dense<0xFF800000> : vector<4x128xf32>
    %9 = vector.multi_reduction <maximumf>, %8, %cst_11 [1] : vector<4x128x128xf32> to vector<4x128xf32>
    %10 = vector.shape_cast %9 : vector<4x128xf32> to vector<4x1x128xf32>
    %c0_i32_12 = arith.constant 0 : i32
    %11 = arith.cmpi eq, %arg2, %c0_i32_12 : i32
    %12 = arith.extui %11 : i1 to i32
    %c0_i32_13 = arith.constant 0 : i32
    %13 = arith.cmpi ne, %12, %c0_i32_13 : i32
    scf.if %13 {
      %20 = vector.broadcast %10 : vector<4x1x128xf32> to vector<4x128x128xf32>
      %21 = arith.subf %8, %20 : vector<4x128x128xf32>
      %22 = math.exp %21 : vector<4x128x128xf32>
      %cst_17 = arith.constant dense<0.000000e+00> : vector<4x128xf32>
      %23 = vector.multi_reduction <add>, %22, %cst_17 [1] : vector<4x128x128xf32> to vector<4x128xf32>
      %24 = vector.shape_cast %23 : vector<4x128xf32> to vector<4x1x128xf32>
      %c0_18 = arith.constant 0 : index
      %c0_19 = arith.constant 0 : index
      %c0_20 = arith.constant 0 : index
      %25 = vector.load %arg8[%c0_18, %c0_19, %c0_20] : memref<4x1x128xf32, #tpu.memory_space<vmem>>, vector<4x1x128xf32>
      tpu.vector_store %arg8[%c0_18, %c0_19, %c0_20], %24 {strides = array<i32>} : memref<4x1x128xf32, #tpu.memory_space<vmem>>, vector<4x1x128xf32>,
      %cst_21 = arith.constant dense<0.000000e+00> : vector<4x32x128xf32>
      %26 = tpu.matmul %7, %22, %cst_21 {dimension_numbers = #tpu.dot_dimension_numbers<[2], [1], [1], [2], [0, 0, 0, 1, 1, 2], [0], [0]>} : vector<4x32x128xf32>, vector<4x128x128xf32>, vector<4x32x128xf32> -> vector<4x32x128xf32>
      %c0_22 = arith.constant 0 : index
      %c0_23 = arith.constant 0 : index
      %c0_24 = arith.constant 0 : index
      %27 = vector.load %arg9[%c0_22, %c0_23, %c0_24] : memref<4x32x128xf32, #tpu.memory_space<vmem>>, vector<4x32x128xf32>
      tpu.vector_store %arg9[%c0_22, %c0_23, %c0_24], %26 {strides = array<i32>} : memref<4x32x128xf32, #tpu.memory_space<vmem>>, vector<4x32x128xf32>,
      %c0_25 = arith.constant 0 : index
      %c0_26 = arith.constant 0 : index
      %c0_27 = arith.constant 0 : index
      %28 = vector.load %arg7[%c0_25, %c0_26, %c0_27] : memref<4x1x128xf32, #tpu.memory_space<vmem>>, vector<4x1x128xf32>
      tpu.vector_store %arg7[%c0_25, %c0_26, %c0_27], %10 {strides = array<i32>} : memref<4x1x128xf32, #tpu.memory_space<vmem>>, vector<4x1x128xf32>,
    } else {
    }
    %c0_i32_14 = arith.constant 0 : i32
    %14 = arith.cmpi sgt, %arg2, %c0_i32_14 : i32
    %15 = arith.extui %14 : i1 to i32
    %c0_i32_15 = arith.constant 0 : i32
    %16 = arith.cmpi ne, %15, %c0_i32_15 : i32
    scf.if %16 {
      %c0_17 = arith.constant 0 : index
      %c0_18 = arith.constant 0 : index
      %c0_19 = arith.constant 0 : index
      %20 = vector.load %arg7[%c0_17, %c0_18, %c0_19] : memref<4x1x128xf32, #tpu.memory_space<vmem>>, vector<4x1x128xf32>
      %21 = arith.maximumf %20, %10 : vector<4x1x128xf32>
      %22 = arith.subf %20, %21 : vector<4x1x128xf32>
      %23 = math.exp %22 : vector<4x1x128xf32>
      %24 = vector.broadcast %21 : vector<4x1x128xf32> to vector<4x128x128xf32>
      %25 = arith.subf %8, %24 : vector<4x128x128xf32>
      %26 = math.exp %25 : vector<4x128x128xf32>
      %c0_20 = arith.constant 0 : index
      %c0_21 = arith.constant 0 : index
      %c0_22 = arith.constant 0 : index
      %27 = vector.load %arg8[%c0_20, %c0_21, %c0_22] : memref<4x1x128xf32, #tpu.memory_space<vmem>>, vector<4x1x128xf32>
      %28 = arith.mulf %23, %27 : vector<4x1x128xf32>
      %cst_23 = arith.constant dense<0.000000e+00> : vector<4x128xf32>
      %29 = vector.multi_reduction <add>, %26, %cst_23 [1] : vector<4x128x128xf32> to vector<4x128xf32>
      %30 = vector.shape_cast %29 : vector<4x128xf32> to vector<4x1x128xf32>
      %31 = arith.addf %28, %30 : vector<4x1x128xf32>
      %c0_24 = arith.constant 0 : index
      %c0_25 = arith.constant 0 : index
      %c0_26 = arith.constant 0 : index
      %32 = vector.load %arg8[%c0_24, %c0_25, %c0_26] : memref<4x1x128xf32, #tpu.memory_space<vmem>>, vector<4x1x128xf32>
      tpu.vector_store %arg8[%c0_24, %c0_25, %c0_26], %31 {strides = array<i32>} : memref<4x1x128xf32, #tpu.memory_space<vmem>>, vector<4x1x128xf32>,
      %cst_27 = arith.constant dense<0.000000e+00> : vector<4x32x128xf32>
      %33 = tpu.matmul %7, %26, %cst_27 {dimension_numbers = #tpu.dot_dimension_numbers<[2], [1], [1], [2], [0, 0, 0, 1, 1, 2], [0], [0]>} : vector<4x32x128xf32>, vector<4x128x128xf32>, vector<4x32x128xf32> -> vector<4x32x128xf32>
      %c0_28 = arith.constant 0 : index
      %c0_29 = arith.constant 0 : index
      %c0_30 = arith.constant 0 : index
      %34 = vector.load %arg9[%c0_28, %c0_29, %c0_30] : memref<4x32x128xf32, #tpu.memory_space<vmem>>, vector<4x32x128xf32>
      %35 = vector.broadcast %23 : vector<4x1x128xf32> to vector<4x32x128xf32>
      %36 = arith.mulf %35, %34 : vector<4x32x128xf32>
      %37 = arith.addf %36, %33 : vector<4x32x128xf32>
      %c0_31 = arith.constant 0 : index
      %c0_32 = arith.constant 0 : index
      %c0_33 = arith.constant 0 : index
      %38 = vector.load %arg9[%c0_31, %c0_32, %c0_33] : memref<4x32x128xf32, #tpu.memory_space<vmem>>, vector<4x32x128xf32>
      tpu.vector_store %arg9[%c0_31, %c0_32, %c0_33], %37 {strides = array<i32>} : memref<4x32x128xf32, #tpu.memory_space<vmem>>, vector<4x32x128xf32>,
      %c0_34 = arith.constant 0 : index
      %c0_35 = arith.constant 0 : index
      %c0_36 = arith.constant 0 : index
      %39 = vector.load %arg7[%c0_34, %c0_35, %c0_36] : memref<4x1x128xf32, #tpu.memory_space<vmem>>, vector<4x1x128xf32>
      tpu.vector_store %arg7[%c0_34, %c0_35, %c0_36], %21 {strides = array<i32>} : memref<4x1x128xf32, #tpu.memory_space<vmem>>, vector<4x1x128xf32>,
    } else {
    }
    %c1_i32 = arith.constant 1 : i32
    %17 = arith.cmpi eq, %arg2, %c1_i32 : i32
    %18 = arith.extui %17 : i1 to i32
    %c0_i32_16 = arith.constant 0 : i32
    %19 = arith.cmpi ne, %18, %c0_i32_16 : i32
    scf.if %19 {
      %c0_17 = arith.constant 0 : index
      %c0_18 = arith.constant 0 : index
      %c0_19 = arith.constant 0 : index
      %20 = vector.load %arg8[%c0_17, %c0_18, %c0_19] : memref<4x1x128xf32, #tpu.memory_space<vmem>>, vector<4x1x128xf32>
      %21 = tpu.reciprocal %20 : vector<4x1x128xf32> -> vector<4x1x128xf32>
      %c0_20 = arith.constant 0 : index
      %c0_21 = arith.constant 0 : index
      %c0_22 = arith.constant 0 : index
      %22 = vector.load %arg9[%c0_20, %c0_21, %c0_22] : memref<4x32x128xf32, #tpu.memory_space<vmem>>, vector<4x32x128xf32>
      %23 = vector.broadcast %21 : vector<4x1x128xf32> to vector<4x32x128xf32>
      %24 = arith.mulf %22, %23 : vector<4x32x128xf32>
      %c0_23 = arith.constant 0 : index
      %c0_24 = arith.constant 0 : index
      %c0_25 = arith.constant 0 : index
      %25 = vector.load %arg6[%c0_23, %c0_24, %c0_25] : memref<4x32x128xf32, #tpu.memory_space<vmem>>, vector<4x32x128xf32>
      tpu.vector_store %arg6[%c0_23, %c0_24, %c0_25], %24 {strides = array<i32>} : memref<4x32x128xf32, #tpu.memory_space<vmem>>, vector<4x32x128xf32>,
    } else {
    }
    return
  }
  func.func @transform_0(%arg0: i32, %arg1: i32, %arg2: i32) -> (i32, i32, i32, i32) {
    %c0_i32 = arith.constant 0 : i32
    %c0_i32_0 = arith.constant 0 : i32
    %c0_i32_1 = arith.constant 0 : i32
    return %arg0, %c0_i32, %c0_i32_0, %arg1 : i32, i32, i32, i32
  }
  func.func @transform_1(%arg0: i32, %arg1: i32, %arg2: i32) -> (i32, i32, i32, i32) {
    %c1_i32 = arith.constant 1 : i32
    %c0_i32 = arith.constant 0 : i32
    %c0_i32_0 = arith.constant 0 : i32
    return %arg0, %c1_i32, %c0_i32, %arg2 : i32, i32, i32, i32
  }
  func.func @transform_2(%arg0: i32, %arg1: i32, %arg2: i32) -> (i32, i32, i32, i32) {
    %c2_i32 = arith.constant 2 : i32
    %c0_i32 = arith.constant 0 : i32
    %c0_i32_0 = arith.constant 0 : i32
    return %arg0, %c2_i32, %c0_i32, %arg2 : i32, i32, i32, i32
  }
  func.func @transform_3(%arg0: i32, %arg1: i32, %arg2: i32) -> (i32, i32, i32) {
    %c0_i32 = arith.constant 0 : i32
    %c0_i32_0 = arith.constant 0 : i32
    return %arg0, %c0_i32, %arg1 : i32, i32, i32
  }
}

</mosaic_0001>

<bundles_post_ra>
// kernel: tpu_custom_call.1
= control target key start
LH: loop header
LB: loop body
LE: loop exit
PB: predicated region body
PF: predicated region fallthrough
CT: control target
= control target key end

     0   :  { %s5854_s0 = inlined_call_operand.hbm [shape: f32[4,3,32,256], index: 0, kind: input, shape index: {}]   ;;  %s5855_s1 = inlined_call_operand.hbm [shape: f32[4,3,32,256], index: 1, kind: input, shape index: {}]   ;;  %s5856_s2 = inlined_call_operand.hbm [shape: f32[4,3,32,256], index: 2, kind: input, shape index: {}]   ;;  %s5857_s3 = inlined_call_operand.hbm [shape: f32[4,32,256], index: 3, kind: output, shape index: {}]  }
   0x1   :  { %5902 = sst [smem:[#allocation84_spill]] %s5854_s0 }
   0x2   :  { %5903 = sst [smem:[#allocation85_spill]] %s5855_s1 }
   0x3   :  { %8 = vsyncpa [#allocation7], 0 }
   0x4   :  { %10 = vsyncpa [#allocation7 + $0x1], 0 }
   0x5   :  { %11 = vsyncpa [#allocation10], 0 }
   0x6   :  { %13 = vsyncpa [#allocation10 + $0x1], 0 }
   0x7   :  { %14 = vsyncpa [#allocation8], 0 }
   0x8   :  { %16 = vsyncpa [#allocation8 + $0x1], 0  ;;  %s4765_s12 = smov 0   ;;  %s4767_s13 = smov 0  }
   0x9   :  { %s4769_s14 = smov 0   ;;  %s4771_s15 = smov 0  }
   0xa   :  { %s4773_s16 = smov 0   ;;  %s4775_s17 = smov 0  }
   0xb   :  { %s4777_s18 = smov 0   ;;  %s4779_s19 = smov 0  }
   0xc   :  { %s4781_s20 = smov 0   ;;  %s4783_s21 = smov 0  }
   0xd   :  { %s4785_s22 = smov 0  }
   0xe LB: > { %5904 = sst [smem:[#allocation25_spill]] %s4698_s17  ;;  %s4821_s23 = sadd.s32 4294967295, %s4718_s22   ;;  %s4718_s22 = sphi %s4785_s22, %s22_s22   ;;  %s4714_s21 = sphi %s4783_s21, %s6066_s21   ;;  %s4710_s20 = sphi %s4781_s20, %s6073_s20   ;;  %s4706_s19 = sphi %s4779_s19, %s6064_s19   ;;  %s4702_s18 = sphi %s4777_s18, %s6072_s18   ;;  %s4698_s17 = sphi %s4775_s17, %s6063_s17   ;;  %s4694_s16 = sphi %s4773_s16, %s6071_s16   ;;  %s4690_s15 = sphi %s4771_s15, %s6070_s15   ;;  %s4686_s14 = sphi %s4769_s14, %s6069_s14   ;;  %s4682_s13 = sphi %s4767_s13, %s6068_s13   ;;  %s4678_s12 = sphi %s4765_s12, %s6067_s12  }
   0xf   : > { %5905 = sst [smem:[#allocation26_spill]] %s4714_s21  ;;  %s3121_s24 = sadd.s32 4294967294, %s4718_s22  }
  0x10   : > { %s34_s25 = sadd.s32 1, %s4710_s20  ;;  %s37_s26 = sadd.s32 1, %s4714_s21 }
  0x11   : > { %p35_p0 = scmp.ge.s32.totalorder %s34_s25, 2  ;;  %s50_s27 = sadd.s32 1, %s4698_s17 }
  0x12   : > { %p57_p1 = scmp.ne.s32.totalorder %s4698_s17, %s4694_s16  ;;  %p58_p2 = scmp.eq.s32.totalorder %s4718_s22, 0 }
  0x13   : > { %s6075_s25 = smov (%p35_p0, %s34_s25), 0  ;;  %s6077_s26 = smov (!%p35_p0, %s37_s26), %s4714_s21 }
  0x14   : > { %5906 = sst [smem:[#allocation27_spill]] %s6075_s25  ;;  %p4838_p3 = por %p58_p2, %p57_p1 }
  0x15   : > { %p5858_p4 = scmp.ne.s32.totalorder %s4694_s16, %s4690_s15  ;;  %p39_p5 = scmp.ge.s32.totalorder %s6077_s26, 2 }
  0x16   : > { %p64_p6 = scmp.eq.s32.totalorder %s4821_s23, 0  ;;  %s74_s29 = ssub.s32 %s4710_s20, %s6075_s25 }
  0x17   : > { %s78_s30 = sadd.s32 1, %s4686_s14  ;;  %s6079_s26 = smov (%p39_p5, %s6077_s26), 0 }
  0x18   : > { %5908 = sst [smem:[#allocation28_spill]] %s6079_s26  ;;  %p4855_p7 = por %p64_p6, %p5858_p4 }
  0x19   : > { %p76_p8 = scmp.eq.s32.totalorder %s74_s29, 0  ;;  %s46_s5 = ssub.s32 %s4714_s21, %s6079_s26 }
  0x1a   : > { %p85_p9 = scmp.ne.s32.totalorder %s4686_s14, %s4682_s13  ;;  %p48_p10 = scmp.eq.s32.totalorder %s46_s5, 0 }
  0x1b   : > { %p91_p11 = scmp.ne.s32.totalorder %s4682_s13, %s4678_s12  ;;  %p145_p0 = scmp.eq.s32.totalorder %s4821_s23, 3 }
  0x1c   : > { %s4866_s6 = scalar_select %p76_p8, %s4686_s14, %s78_s30  }
  0x1d   : > { %s4869_s7 = scalar_select %p48_p10, %s4698_s17, %s50_s27  }
  0x1e   : > { %5910 = sst [smem:[#allocation29_spill]] %s4866_s6  ;;  %p4873_p12 = por %p85_p9, %p58_p2 }
  0x1f   : > { %5911 = sst [smem:[#allocation30_spill]] %s4869_s7  ;;  %p4879_p13 = por %p91_p11, %p64_p6 }
  0x20   : > { %p151_p5 = scmp.eq.s32.totalorder %s3121_s24, 3  ;;  %p4887_p4 = por %p145_p0, %p57_p1 }
  0x21   : > { %p5915_p8 = scmp.ne.s32.totalorder %s4694_s16, %s4690_s15  ;;  %p3123_p2 = scmp.ge.s32.totalorder %s4718_s22, 4 }
  0x23   : > { %p4894_p10 = por %p151_p5, %p5915_p8  ;;  %167 = sbr.rel (%p3123_p2) target bundleno = 84 (0x54), region = 16 }
  0x25   : > { %s5916_s11 = scalar_select %p4894_p10, 1, 0 }
  0x27   : > { %5917 = sst [smem:[#allocation31_spill]] %s5916_s11 }
  0x2a   : > { %s171_s12 = sand.u32 1, %s4698_s17   ;;  %s3125_s24 = sshll.u32 %s4714_s21, 7 }
  0x2b   : > { %s3124_s27 = sshll.u32 %s171_s12, 7  ;;  %s5918_s0 = sld [smem:[#allocation84_spill]] }
  0x2c   : > { %s4173_s26 = scalar_select %p4838_p3, [#allocation0], [#allocation19] }
  0x2d   : > { %s175_s25 = scalar_lea.vmem [#allocation6], %s3124_s27  ;;  %s4720_s11 = smov 3072  }
  0x2e   : > { %s196_s7 = sshll.u32 %s175_s25, 4  ;;  %s188_s6 = sld [smem:[%s4173_s26]]   ;;  %s197_s7 = int_to_ptr.vmem [resolvable:$true] %s196_s7 }
  0x2f   : > { %4174 = sst [smem:[#allocation14]] (%p4838_p3), %s4720_s11  ;;  %s4721_s17 = smov 512  }
  0x30   : > { %4175 = sst [smem:[#allocation14 + $0x1]] (%p4838_p3), %s4721_s17  ;;  %s4722_s21 = smov 4  }
  0x31   : > { %s183_s5 = scalar_lea.hbm %s5918_s0, %s3125_s24  ;;  %4176 = sst [smem:[#allocation14 + $0x2]] (%p4838_p3), %s4722_s21 }
  0x32   : > { %s4723_s29 = smov 256   ;;  %s4724_s24 = smov 128  }
  0x33   : > { %4177 = sst [smem:[#allocation14 + $0x3]] (%p4838_p3), %s4723_s29  ;;  %s4725_s25 = smov 8  }
  0x34   : > { %4178 = sst [smem:[#allocation14 + $0x4]] (%p4838_p3), %s4724_s24  ;;  %s3126_s27 = sshll.u32 %s188_s6, 26 }
  0x35   : > { %4179 = sst [smem:[#allocation14 + $0x5]] (%p4838_p3), %s4725_s25  ;;  %s3127_s26 = sadd.s32 134217728, %s3126_s27 }
  0x36   : > { %s172_s30 = scalar_lea.sflag [#allocation7], %s171_s12  ;;  %s4726_s0 = smov [#allocation13]  }
  0x37   : > { %4180 = dma.general (%p4838_p3), %s183_s5, 2048, %s197_s7, %s172_s30, %s4726_s0, [#allocation14], %s3127_s26, 0  }
  0x38   : > { %s219_s17 = sand.u32 1, %s4718_s22   ;;  %s221_s21 = sand.u32 1, %s4686_s14  }
  0x39   : > { %s4922_s11 = sshll.u32 %s221_s21, 7  ;;  %s3129_s6 = sshll.u32 %s4710_s20, 7 }
  0x3a   : > { %s5919_s1 = sld [smem:[#allocation85_spill]]  ;;  %s223_s0 = scalar_lea.vmem [#allocation9], %s4922_s11 }
  0x3b   : > { %s245_s28 = sshll.u32 %s223_s0, 4  ;;  %s4727_s25 = smov 3072   ;;  %s246_s28 = int_to_ptr.vmem [resolvable:$true] %s245_s28 }
  0x3c   : > { %s4181_s5 = scalar_select %p4873_p12, [#allocation0], [#allocation20] }
  0x3d   : > { %4182 = sst [smem:[#allocation16]] (%p4873_p12), %s4727_s25  ;;  %s4728_s26 = smov 512  }
  0x3e   : > { %s237_s27 = sld [smem:[%s4181_s5]]   ;;  %s4729_s30 = smov 4  }
  0x3f   : > { %4183 = sst [smem:[#allocation16 + $0x1]] (%p4873_p12), %s4728_s26  ;;  %s4730_s21 = smov 256  }
  0x40   : > { %s3023_s12 = scalar_lea.hbm %s5919_s1, %s3129_s6  ;;  %4184 = sst [smem:[#allocation16 + $0x2]] (%p4873_p12), %s4729_s30 }
  0x41   : > { %s3024_s7 = scalar_lea.hbm %s3023_s12, 1024  ;;  %4185 = sst [smem:[#allocation16 + $0x3]] (%p4873_p12), %s4730_s21 }
  0x42   : > { %s4731_s29 = smov 128   ;;  %s4732_s24 = smov 8  }
  0x43   : > { %4186 = sst [smem:[#allocation16 + $0x4]] (%p4873_p12), %s4731_s29  ;;  %s220_s5 = scalar_lea.sflag [#allocation10], %s219_s17 }
  0x44   : > { %4187 = sst [smem:[#allocation16 + $0x5]] (%p4873_p12), %s4732_s24  ;;  %s3130_s12 = sshll.u32 %s237_s27, 26 }
  0x45   : > { %s3131_s0 = sadd.s32 134217728, %s3130_s12  ;;  %s4733_s1 = smov [#allocation15]  }
  0x46   : > { %4188 = dma.general (%p4873_p12), %s3024_s7, 2048, %s246_s28, %s220_s5, %s4733_s1, [#allocation16], %s3131_s0, 0  }
  0x47   : > { %s3031_s30 = scalar_lea.hbm %s5856_s2, %s3129_s6  ;;  %s272_s29 = scalar_lea.vmem [#allocation11], %s4922_s11 }
  0x48   : > { %s3032_s21 = scalar_lea.hbm %s3031_s30, 2048  ;;  %s294_s24 = sshll.u32 %s272_s29, 4  ;;  %s295_s24 = int_to_ptr.vmem [resolvable:$true] %s294_s24 }
  0x49   : > { %s4189_s17 = scalar_select %p4873_p12, [#allocation0], [#allocation21] }
  0x4a   : > { %s4734_s1 = smov 3072   ;;  %s4735_s28 = smov 512  }
  0x4b   : > { %s286_s27 = sld [smem:[%s4189_s17]]   ;;  %s4736_s7 = smov 4  }
  0x4c   : > { %4190 = sst [smem:[#allocation18]] (%p4873_p12), %s4734_s1  ;;  %s4737_s6 = smov 256  }
  0x4d   : > { %4191 = sst [smem:[#allocation18 + $0x1]] (%p4873_p12), %s4735_s28  ;;  %s4738_s11 = smov 128  }
  0x4e   : > { %4192 = sst [smem:[#allocation18 + $0x2]] (%p4873_p12), %s4736_s7  ;;  %s4739_s0 = smov 8  }
  0x4f   : > { %4193 = sst [smem:[#allocation18 + $0x3]] (%p4873_p12), %s4737_s6  ;;  %s4740_s26 = smov [#allocation17]  }
  0x50   : > { %4194 = sst [smem:[#allocation18 + $0x4]] (%p4873_p12), %s4738_s11 }
  0x51   : > { %s3134_s12 = sshll.u32 %s286_s27, 26  ;;  %4195 = sst [smem:[#allocation18 + $0x5]] (%p4873_p12), %s4739_s0 }
  0x52   : > { %s3135_s25 = sadd.s32 134217728, %s3134_s12 }
  0x53   : > { %4196 = dma.general (%p4873_p12), %s3032_s21, 2048, %s295_s24, %s220_s5, %s4740_s26, [#allocation18], %s3135_s25, 0  }
  0x54 PF: > { %p3136_p1 = scmp.ge.s32.totalorder %s4718_s22, 1  ;;  %p315_p3 = scmp.lt.s32.totalorder %s4718_s22, 5 }
  0x56   : > { %p316_p6 = pnand %p3136_p1, %p315_p3 }
  0x58   : > { %319 = sbr.rel (%p316_p6) target bundleno = 1270 (0x4f6), region = 32 }
  0x5f   : > { %s4968_s30 = sand.u32 1, %s4694_s16  }
  0x60   : > { %s3137_s29 = sshll.u32 %s4968_s30, 7  ;;  %s322_s17 = scalar_lea.sflag [#allocation7], %s4968_s30 }
  0x61   : > { %s4972_s27 = scalar_lea.vmem [#allocation6], %s3137_s29 }
  0x62   : > { %4665 = dma.done.wait (%p4855_p7), %s322_s17, 2048  }
  0x63   : > { %4667 = vsyncadd (%p4855_p7), %s322_s17, 4294965248  ;;  %s330_s8 = sand.u32 1, %s4821_s23   ;;  %s332_s5 = sand.u32 1, %s4682_s13  }
  0x64   : > { %s3138_s21 = sshll.u32 %s332_s5, 7  ;;  %s331_s24 = scalar_lea.sflag [#allocation10], %s330_s8 }
  0x65   : > { %s4980_s1 = scalar_lea.vmem [#allocation9], %s3138_s21 }
  0x66   : > { %4669 = dma.done.wait (%p4879_p13), %s331_s24, 4096  }
  0x67   : > { %4671 = vsyncadd (%p4879_p13), %s331_s24, 4294963200  ;;  %s4986_s28 = scalar_lea.vmem [#allocation11], %s3138_s21  ;;  %s4988_s7 = scalar_lea.vmem [#allocation12], %s3137_s29 }
  0x68   : > { %p3141_p7 = scmp.ne.s32.totalorder %s4702_s18, 0 }
  0x69   : > { %v384_v0 = vld [vmem:[%s4972_s27] sm:$0xff] (!%p3141_p7)  ;;  %v385_v1 = vld [vmem:[%s4972_s27 + $0x8] sm:$0xff] (!%p3141_p7)  ;;  %v386_v2 = vld [vmem:[%s4972_s27 + $0x10] sm:$0xff] (!%p3141_p7) }
  0x6a   : > { %383 = sbr.rel (%p3141_p7) target bundleno = 119 (0x77), region = 48  ;;  %v400_v3 = vmul.f32 (!%p3141_p7), 0.17677669, %v384_v0  ;;  %v401_v4 = vmul.f32 (!%p3141_p7), 0.17677669, %v385_v1  ;;  %v387_v6 = vld [vmem:[%s4972_s27 + $0x18] sm:$0xff] (!%p3141_p7) }
  0x6b   : > { %v402_v5 = vmul.f32 (!%p3141_p7), 0.17677669, %v386_v2  ;;  %v388_v7 = vld [vmem:[%s4972_s27 + $0x20] sm:$0xff] (!%p3141_p7)  ;;  %v389_v8 = vld [vmem:[%s4972_s27 + $0x28] sm:$0xff] (!%p3141_p7)  ;;  %v403_v9 = vmul.f32 (!%p3141_p7), 0.17677669, %v387_v6 }
  0x6c   : > { %416 = vst [vmem:[#allocation5] sm:$0xff] (!%p3141_p7), %v400_v3  ;;  %417 = vst [vmem:[#allocation5 + $0x8] sm:$0xff] (!%p3141_p7), %v401_v4  ;;  %v404_v10 = vmul.f32 (!%p3141_p7), 0.17677669, %v388_v7  ;;  %v405_v11 = vmul.f32 (!%p3141_p7), 0.17677669, %v389_v8 }
  0x6d   : > { %418 = vst [vmem:[#allocation5 + $0x10] sm:$0xff] (!%p3141_p7), %v402_v5  ;;  %v390_v12 = vld [vmem:[%s4972_s27 + $0x30] sm:$0xff] (!%p3141_p7)  ;;  %v391_v13 = vld [vmem:[%s4972_s27 + $0x38] sm:$0xff] (!%p3141_p7)  ;;  %v392_v14 = vld [vmem:[%s4972_s27 + $0x40] sm:$0xff] (!%p3141_p7) }
  0x6e   : > { %419 = vst [vmem:[#allocation5 + $0x18] sm:$0xff] (!%p3141_p7), %v403_v9  ;;  %420 = vst [vmem:[#allocation5 + $0x20] sm:$0xff] (!%p3141_p7), %v404_v10  ;;  %v406_v15 = vmul.f32 (!%p3141_p7), 0.17677669, %v390_v12  ;;  %v407_v16 = vmul.f32 (!%p3141_p7), 0.17677669, %v391_v13 }
  0x6f   : > { %421 = vst [vmem:[#allocation5 + $0x28] sm:$0xff] (!%p3141_p7), %v405_v11  ;;  %v408_v17 = vmul.f32 (!%p3141_p7), 0.17677669, %v392_v14  ;;  %v393_v18 = vld [vmem:[%s4972_s27 + $0x48] sm:$0xff] (!%p3141_p7)  ;;  %v394_v19 = vld [vmem:[%s4972_s27 + $0x50] sm:$0xff] (!%p3141_p7)  ;;  %v395_v20 = vld [vmem:[%s4972_s27 + $0x58] sm:$0xff] (!%p3141_p7) }
  0x70   : > { %422 = vst [vmem:[#allocation5 + $0x30] sm:$0xff] (!%p3141_p7), %v406_v15  ;;  %423 = vst [vmem:[#allocation5 + $0x38] sm:$0xff] (!%p3141_p7), %v407_v16  ;;  %v409_v21 = vmul.f32 (!%p3141_p7), 0.17677669, %v393_v18  ;;  %v410_v22 = vmul.f32 (!%p3141_p7), 0.17677669, %v394_v19 }
  0x71   : > { %424 = vst [vmem:[#allocation5 + $0x40] sm:$0xff] %v408_v17  ;;  %v411_v23 = vmul.f32 0.17677669, %v395_v20  ;;  %v396_v24 = vld [vmem:[%s4972_s27 + $0x60] sm:$0xff]  ;;  %v397_v25 = vld [vmem:[%s4972_s27 + $0x68] sm:$0xff]  ;;  %v398_v26 = vld [vmem:[%s4972_s27 + $0x70] sm:$0xff] }
  0x72   : > { %425 = vst [vmem:[#allocation5 + $0x48] sm:$0xff] %v409_v21  ;;  %426 = vst [vmem:[#allocation5 + $0x50] sm:$0xff] %v410_v22  ;;  %v412_v27 = vmul.f32 0.17677669, %v396_v24  ;;  %v413_v28 = vmul.f32 0.17677669, %v397_v25 }
  0x73   : > { %427 = vst [vmem:[#allocation5 + $0x58] sm:$0xff] %v411_v23  ;;  %v414_v29 = vmul.f32 0.17677669, %v398_v26  ;;  %v399_v30 = vld [vmem:[%s4972_s27 + $0x78] sm:$0xff] }
  0x74   : > { %428 = vst [vmem:[#allocation5 + $0x60] sm:$0xff] %v412_v27  ;;  %429 = vst [vmem:[#allocation5 + $0x68] sm:$0xff] %v413_v28  ;;  %v415_v31 = vmul.f32 0.17677669, %v399_v30 }
  0x75   : > { %430 = vst [vmem:[#allocation5 + $0x70] sm:$0xff] %v414_v29 }
  0x76   : > { %431 = vst [vmem:[#allocation5 + $0x78] sm:$0xff] %v415_v31 }
  0x77 PF: > { %v452_v32 = vld [vmem:[%s4980_s1 + $0x20] sm:$0xff]  ;;  %v453_v34 = vld [vmem:[%s4980_s1 + $0x28] sm:$0xff]  ;;  %v454_v36 = vld [vmem:[%s4980_s1 + $0x30] sm:$0xff]  ;;  %vm512_vm0 = vcmask 261120  }
  0x78   : > { %v448_v33 = vld [vmem:[%s4980_s1] sm:$0xff]  ;;  %706 = vxpose.xlu1.b32.start [1/4] (short) %v452_v32, 128  ;;  %v449_v35 = vld [vmem:[%s4980_s1 + $0x8] sm:$0xff]  ;;  %v450_v37 = vld [vmem:[%s4980_s1 + $0x10] sm:$0xff] }
  0x79   : > { %480 = vxpose.xlu0.b32.start [1/4] (short) %v448_v33, 128  ;;  %v432_v38 = vld [vmem:[#allocation5] sm:$0xff]  ;;  %v433_v39 = vld [vmem:[#allocation5 + $0x8] sm:$0xff]  ;;  %v5022_v42 = vld [vmem:[%s4986_s28 + $0x10] sm:$0xff] }
  0x7a   : > { %v5016_v40 = vld [vmem:[%s4986_s28] sm:$0xff]  ;;  %v5019_v41 = vld [vmem:[%s4986_s28 + $0x8] sm:$0xff]  ;;  %5921 = vst [vmem:[#allocation33_spill] sm:$0xff] %v5022_v42  ;;  %v3885_v43 = vpack.c.bf16 %v433_v39, %v432_v38  ;;  %v5025_v44 = vld [vmem:[%s4986_s28 + $0x18] sm:$0xff] }
  0x7b   : > { %5920 = vst [vmem:[#allocation32_spill] sm:$0xff] %v5019_v41  ;;  %5922 = vst [vmem:[#allocation34_spill] sm:$0xff] %v5025_v44  ;;  %v5028_v45 = vld [vmem:[%s4986_s28 + $0x20] sm:$0xff]  ;;  %v5031_v46 = vld [vmem:[%s4986_s28 + $0x28] sm:$0xff] }
  0x7c   : > { %707 = vxpose.xlu1.b32.cont [2/4] (short) %v453_v34, 128  ;;  %5923 = vst [vmem:[#allocation35_spill] sm:$0xff] %v5031_v46  ;;  %v455_v47 = vld [vmem:[%s4980_s1 + $0x38] sm:$0xff]  ;;  %v5036_v49 = vld [vmem:[%s4986_s28 + $0x30] sm:$0xff]  ;;  %v5042_v51 = vld [vmem:[%s4986_s28 + $0x40] sm:$0xff]  ;;  %3886 = vmatprep.subr.bf16.mxu0 %v3885_v43 }
  0x7d   : > { %481 = vxpose.xlu0.b32.cont [2/4] (short) %v449_v35, 128  ;;  %v451_v48 = vld [vmem:[%s4980_s1 + $0x18] sm:$0xff]  ;;  %5924 = vst [vmem:[#allocation36_spill] sm:$0xff] %v5036_v49  ;;  %5926 = vst [vmem:[#allocation38_spill] sm:$0xff] %v5042_v51  ;;  %v5045_v52 = vld [vmem:[%s4986_s28 + $0x48] sm:$0xff]  ;;  %3888 = vmatpush3.bf16.msra.mxu0 %v3885_v43 }
  0x7e   : > { %v5039_v50 = vld [vmem:[%s4986_s28 + $0x38] sm:$0xff]  ;;  %5927 = vst [vmem:[#allocation39_spill] sm:$0xff] %v5045_v52  ;;  %v5048_v53 = vld [vmem:[%s4986_s28 + $0x50] sm:$0xff]  ;;  %v5054_v55 = vld [vmem:[%s4986_s28 + $0x60] sm:$0xff] }
  0x7f   : > { %5925 = vst [vmem:[#allocation37_spill] sm:$0xff] %v5039_v50  ;;  %5928 = vst [vmem:[#allocation40_spill] sm:$0xff] %v5048_v53  ;;  %v5051_v54 = vld [vmem:[%s4986_s28 + $0x58] sm:$0xff]  ;;  %v5057_v56 = vld [vmem:[%s4986_s28 + $0x68] sm:$0xff] }
  0x80   : > { %708 = vxpose.xlu1.b32.cont [3/4] (short) %v454_v36, 128  ;;  %5929 = vst [vmem:[#allocation41_spill] sm:$0xff] %v5051_v54  ;;  %5930 = vst [vmem:[#allocation42_spill] sm:$0xff] %v5054_v55  ;;  %v5060_v57 = vld [vmem:[%s4986_s28 + $0x70] sm:$0xff]  ;;  %v5063_v58 = vld [vmem:[%s4986_s28 + $0x78] sm:$0xff] }
  0x81   : > { %482 = vxpose.xlu0.b32.cont [3/4] (short) %v450_v37, 128  ;;  %5931 = vst [vmem:[#allocation43_spill] sm:$0xff] %v5057_v56  ;;  %5932 = vst [vmem:[#allocation44_spill] sm:$0xff] %v5060_v57  ;;  %v436_v59 = vld [vmem:[#allocation5 + $0x20] sm:$0xff]  ;;  %v437_v60 = vld [vmem:[#allocation5 + $0x28] sm:$0xff] }
  0x82   : > { %5933 = vst [vmem:[#allocation45_spill] sm:$0xff] %v5063_v58  ;;  %v3893_v61 = vpack.c.bf16 %v437_v60, %v436_v59  ;;  %v434_v62 = vld [vmem:[#allocation5 + $0x10] sm:$0xff]  ;;  %v435_v63 = vld [vmem:[#allocation5 + $0x18] sm:$0xff]  ;;  %v460_v4 = vld [vmem:[%s4980_s1 + $0x60] sm:$0xff] }
  0x83   : > { %v438_v0 = vld [vmem:[#allocation5 + $0x30] sm:$0xff]  ;;  %v3889_v1 = vpack.c.bf16 %v435_v63, %v434_v62  ;;  %v439_v2 = vld [vmem:[#allocation5 + $0x38] sm:$0xff]  ;;  %v456_v5 = vld [vmem:[%s4980_s1 + $0x40] sm:$0xff] }
  0x84   : > { %709 = vxpose.xlu1.b32.end [4/4] (short) %v455_v47, 128  ;;  %3894 = vmatprep.subr.bf16.mxu1 %v3893_v61  ;;  %v3897_v3 = vpack.c.bf16 %v439_v2, %v438_v0  ;;  %v440_v6 = vld [vmem:[#allocation5 + $0x40] sm:$0xff]  ;;  %v441_v7 = vld [vmem:[#allocation5 + $0x48] sm:$0xff]  ;;  %v462_v14 = vld [vmem:[%s4980_s1 + $0x70] sm:$0xff] }
  0x85   : > { %483 = vxpose.xlu0.b32.end [4/4] (short) %v451_v48, 128  ;;  %3896 = vmatpush3.bf16.msra.mxu1 %v3893_v61  ;;  %v444_v8 = vld [vmem:[#allocation5 + $0x60] sm:$0xff]  ;;  %v3901_v9 = vpack.c.bf16 %v441_v7, %v440_v6  ;;  %v445_v10 = vld [vmem:[#allocation5 + $0x68] sm:$0xff]  ;;  %v458_v15 = vld [vmem:[%s4980_s1 + $0x50] sm:$0xff] }
  0x86   : > { %3890 = vmatprep.subr.bf16.mxu0 %v3889_v1  ;;  %3898 = vmatprep.subr.bf16.mxu1 %v3897_v3  ;;  %v3909_v11 = vpack.c.bf16 %v445_v10, %v444_v8  ;;  %v461_v12 = vld [vmem:[%s4980_s1 + $0x68] sm:$0xff]  ;;  %v463_v16 = vld [vmem:[%s4980_s1 + $0x78] sm:$0xff]  ;;  %v442_v18 = vld [vmem:[#allocation5 + $0x50] sm:$0xff] }
  0x87   : > { %3892 = vmatpush3.bf16.msra.mxu0 %v3889_v1  ;;  %v457_v13 = vld [vmem:[%s4980_s1 + $0x48] sm:$0xff]  ;;  %v459_v17 = vld [vmem:[%s4980_s1 + $0x58] sm:$0xff]  ;;  %v446_v22 = vld [vmem:[#allocation5 + $0x70] sm:$0xff] }
  0x88   : > { %3902 = vmatprep.subr.bf16.mxu0 %v3901_v9  ;;  %v443_v21 = vld [vmem:[#allocation5 + $0x58] sm:$0xff] }
  0x89   : > { %3900 = vmatpush3.bf16.msra.mxu1 %v3897_v3  ;;  %v447_v23 = vld [vmem:[#allocation5 + $0x78] sm:$0xff]  ;;  %v3905_v24 = vpack.c.bf16 %v443_v21, %v442_v18 }
  0x8a   : > { %3910 = vmatprep.subr.bf16.mxu1 %v3909_v11  ;;  %v3913_v25 = vpack.c.bf16 %v447_v23, %v446_v22 }
  0xb5   : > { %1156 = vxpose.xlu1.b32.start [1/4] (short) %v460_v4, 128 }
  0xb6   : > { %931 = vxpose.xlu0.b32.start [1/4] (short) %v456_v5, 128 }
  0xb9   : > { %1157 = vxpose.xlu1.b32.cont [2/4] (short) %v461_v12, 128 }
  0xba   : > { %932 = vxpose.xlu0.b32.cont [2/4] (short) %v457_v13, 128 }
  0xbd   : > { %1158 = vxpose.xlu1.b32.cont [3/4] (short) %v462_v14, 128 }
  0xbe   : > { %933 = vxpose.xlu0.b32.cont [3/4] (short) %v458_v15, 128 }
  0xc1   : > { %1159 = vxpose.xlu1.b32.end [4/4] (short) %v463_v16, 128 }
  0xc2   : > { %934 = vxpose.xlu0.b32.end [4/4] (short) %v459_v17, 128 }
  0xf8   : > { %v722_v19 = vpop.trf.xlu1 }
  0xf9   : > { %v496_v20 = vpop.trf.xlu0  ;;  %3493 = vmatprep.mubr.msk.f32.mxu1 %vm512_vm0, %v722_v19 }
  0xfa   : > { %3461 = vmatprep.mubr.msk.f32.mxu0 %vm512_vm0, %v496_v20 }
  0xfc   : > { %v723_v26 = vpop.trf.xlu1 }
  0xfd   : > { %v497_v27 = vpop.trf.xlu0  ;;  %3494 = vmatmul.mubr.msk.f32.vlgmr.msra.gmra.mrb[0].mxu1 %vm512_vm0, %v723_v26 }
  0xfe   : > { %3462 = vmatmul.mubr.msk.f32.vlgmr.msra.gmra.mrb[0].mxu0 %vm512_vm0, %v497_v27  ;;  %3912 = vmatpush3.bf16.msra.mxu1 %v3909_v11 }
  0xff   : > { %3904 = vmatpush3.bf16.msra.mxu0 %v3901_v9  ;;  %3914 = vmatprep.subr.bf16.mxu1 %v3913_v25 }
 0x100   : > { %3906 = vmatprep.subr.bf16.mxu0 %v3905_v24  ;;  %v724_v28 = vpop.trf.xlu1 }
 0x101   : > { %v498_v29 = vpop.trf.xlu0  ;;  %3496 = vmatprep.mubr.msk.f32.mxu1 %vm512_vm0, %v724_v28 }
 0x102   : > { %3464 = vmatprep.mubr.msk.f32.mxu0 %vm512_vm0, %v498_v29  ;;  %3916 = vmatpush3.bf16.msra.mxu1 %v3913_v25 }
 0x103   : > { %3908 = vmatpush3.bf16.msra.mxu0 %v3905_v24 }
 0x104   : > { %v725_v30 = vpop.trf.xlu1 }
 0x105   : > { %v499_v31 = vpop.trf.xlu0  ;;  %3497 = vmatmul.mubr.msk.f32.gmra.mrb[2].mxu1 %vm512_vm0, %v725_v30 }
 0x106   : > { %3465 = vmatmul.mubr.msk.f32.gmra.mrb[2].mxu0 %vm512_vm0, %v499_v31 }
 0x108   : > { %v726_v32 = vpop.trf.xlu1 }
 0x109   : > { %v500_v33 = vpop.trf.xlu0  ;;  %3499 = vmatprep.mubr.msk.f32.mxu1 %vm512_vm0, %v726_v32 }
 0x10a   : > { %3467 = vmatprep.mubr.msk.f32.mxu0 %vm512_vm0, %v500_v33 }
 0x10c   : > { %v727_v34 = vpop.trf.xlu1 }
 0x10d   : > { %v501_v35 = vpop.trf.xlu0  ;;  %3500 = vmatmul.mubr.msk.f32.gmra.mrb[4].mxu1 %vm512_vm0, %v727_v34 }
 0x10e   : > { %3468 = vmatmul.mubr.msk.f32.gmra.mrb[4].mxu0 %vm512_vm0, %v501_v35 }
 0x110   : > { %v728_v36 = vpop.trf.xlu1 }
 0x111   : > { %v502_v37 = vpop.trf.xlu0  ;;  %3502 = vmatprep.mubr.msk.f32.mxu1 %vm512_vm0, %v728_v36 }
 0x112   : > { %3470 = vmatprep.mubr.msk.f32.mxu0 %vm512_vm0, %v502_v37 }
 0x114   : > { %v729_v38 = vpop.trf.xlu1 }
 0x115   : > { %v503_v39 = vpop.trf.xlu0  ;;  %3503 = vmatmul.mubr.msk.f32.gmra.mrb[6].mxu1 %vm512_vm0, %v729_v38 }
 0x116   : > { %3471 = vmatmul.mubr.msk.f32.gmra.mrb[6].mxu0 %vm512_vm0, %v503_v39 }
 0x118   : > { %v730_v43 = vpop.trf.xlu1 }
 0x119   : > { %v504_v47 = vpop.trf.xlu0  ;;  %3505 = vmatprep.mubr.msk.f32.mxu1 %vm512_vm0, %v730_v43 }
 0x11a   : > { %3473 = vmatprep.mubr.msk.f32.mxu0 %vm512_vm0, %v504_v47 }
 0x11c   : > { %v731_v48 = vpop.trf.xlu1 }
 0x11d   : > { %v505_v59 = vpop.trf.xlu0  ;;  %3506 = vmatmul.mubr.msk.f32.gmra.mrb[8].mxu1 %vm512_vm0, %v731_v48 }
 0x11e   : > { %3474 = vmatmul.mubr.msk.f32.gmra.mrb[8].mxu0 %vm512_vm0, %v505_v59 }
 0x120   : > { %v732_v60 = vpop.trf.xlu1 }
 0x121   : > { %v506_v61 = vpop.trf.xlu0  ;;  %3508 = vmatprep.mubr.msk.f32.mxu1 %vm512_vm0, %v732_v60 }
 0x122   : > { %3476 = vmatprep.mubr.msk.f32.mxu0 %vm512_vm0, %v506_v61 }
 0x124   : > { %v733_v62 = vpop.trf.xlu1 }
 0x125   : > { %v507_v63 = vpop.trf.xlu0  ;;  %3509 = vmatmul.mubr.msk.f32.gmra.mrb[10].mxu1 %vm512_vm0, %v733_v62 }
 0x126   : > { %3477 = vmatmul.mubr.msk.f32.gmra.mrb[10].mxu0 %vm512_vm0, %v507_v63 }
 0x128   : > { %v734_v0 = vpop.trf.xlu1 }
 0x129   : > { %v508_v1 = vpop.trf.xlu0  ;;  %3511 = vmatprep.mubr.msk.f32.mxu1 %vm512_vm0, %v734_v0 }
 0x12a   : > { %3479 = vmatprep.mubr.msk.f32.mxu0 %vm512_vm0, %v508_v1 }
 0x12c   : > { %v735_v2 = vpop.trf.xlu1 }
 0x12d   : > { %v509_v3 = vpop.trf.xlu0  ;;  %3512 = vmatmul.mubr.msk.f32.gmra.mrb[12].mxu1 %vm512_vm0, %v735_v2 }
 0x12e   : > { %3480 = vmatmul.mubr.msk.f32.gmra.mrb[12].mxu0 %vm512_vm0, %v509_v3 }
 0x130   : > { %v736_v4 = vpop.trf.xlu1 }
 0x131   : > { %v510_v5 = vpop.trf.xlu0  ;;  %3514 = vmatprep.mubr.msk.f32.mxu1 %vm512_vm0, %v736_v4 }
 0x132   : > { %3482 = vmatprep.mubr.msk.f32.mxu0 %vm512_vm0, %v510_v5 }
 0x134   : > { %v737_v6 = vpop.trf.xlu1 }
 0x135   : > { %v511_v7 = vpop.trf.xlu0  ;;  %3515 = vmatmul.mubr.msk.f32.gmra.mrb[14].mxu1 %vm512_vm0, %v737_v6 }
 0x136   : > { %3483 = vmatmul.mubr.msk.f32.gmra.mrb[14].mxu0 %vm512_vm0, %v511_v7 }
 0x138   : > { %v1172_v8 = vpop.trf.xlu1 }
 0x139   : > { %v947_v9 = vpop.trf.xlu0  ;;  %3557 = vmatprep.mubr.msk.f32.mxu1 %vm512_vm0, %v1172_v8 }
 0x13a   : > { %3525 = vmatprep.mubr.msk.f32.mxu0 %vm512_vm0, %v947_v9 }
 0x13c   : > { %v1173_v10 = vpop.trf.xlu1 }
 0x13d   : > { %v948_v11 = vpop.trf.xlu0  ;;  %3558 = vmatmul.mubr.msk.f32.vlgmr.msra.gmra.mrb[16].mxu1 %vm512_vm0, %v1173_v10 }
 0x13e   : > { %3526 = vmatmul.mubr.msk.f32.vlgmr.msra.gmra.mrb[16].mxu0 %vm512_vm0, %v948_v11 }
 0x140   : > { %v1174_v12 = vpop.trf.xlu1 }
 0x141   : > { %v949_v13 = vpop.trf.xlu0  ;;  %3560 = vmatprep.mubr.msk.f32.mxu1 %vm512_vm0, %v1174_v12 }
 0x142   : > { %3528 = vmatprep.mubr.msk.f32.mxu0 %vm512_vm0, %v949_v13 }
 0x144   : > { %v1175_v14 = vpop.trf.xlu1 }
 0x145   : > { %v950_v15 = vpop.trf.xlu0  ;;  %3561 = vmatmul.mubr.msk.f32.gmra.mrb[18].mxu1 %vm512_vm0, %v1175_v14 }
 0x146   : > { %3529 = vmatmul.mubr.msk.f32.gmra.mrb[18].mxu0 %vm512_vm0, %v950_v15 }
 0x148   : > { %v1176_v16 = vpop.trf.xlu1 }
 0x149   : > { %v951_v17 = vpop.trf.xlu0  ;;  %3563 = vmatprep.mubr.msk.f32.mxu1 %vm512_vm0, %v1176_v16 }
 0x14a   : > { %3531 = vmatprep.mubr.msk.f32.mxu0 %vm512_vm0, %v951_v17 }
 0x14c   : > { %v1177_v18 = vpop.trf.xlu1 }
 0x14d   : > { %v952_v19 = vpop.trf.xlu0  ;;  %3564 = vmatmul.mubr.msk.f32.gmra.mrb[20].mxu1 %vm512_vm0, %v1177_v18 }
 0x14e   : > { %3532 = vmatmul.mubr.msk.f32.gmra.mrb[20].mxu0 %vm512_vm0, %v952_v19 }
 0x150   : > { %v1178_v20 = vpop.trf.xlu1 }
 0x151   : > { %v953_v21 = vpop.trf.xlu0  ;;  %3566 = vmatprep.mubr.msk.f32.mxu1 %vm512_vm0, %v1178_v20 }
 0x152   : > { %3534 = vmatprep.mubr.msk.f32.mxu0 %vm512_vm0, %v953_v21 }
 0x154   : > { %v1179_v22 = vpop.trf.xlu1 }
 0x155   : > { %v954_v23 = vpop.trf.xlu0  ;;  %3567 = vmatmul.mubr.msk.f32.gmra.mrb[22].mxu1 %vm512_vm0, %v1179_v22 }
 0x156   : > { %3535 = vmatmul.mubr.msk.f32.gmra.mrb[22].mxu0 %vm512_vm0, %v954_v23 }
 0x158   : > { %v1180_v24 = vpop.trf.xlu1 }
 0x159   : > { %v955_v25 = vpop.trf.xlu0  ;;  %3569 = vmatprep.mubr.msk.f32.mxu1 %vm512_vm0, %v1180_v24 }
 0x15a   : > { %3537 = vmatprep.mubr.msk.f32.mxu0 %vm512_vm0, %v955_v25 }
 0x15c   : > { %v1181_v26 = vpop.trf.xlu1 }
 0x15d   : > { %v956_v27 = vpop.trf.xlu0  ;;  %3570 = vmatmul.mubr.msk.f32.gmra.mrb[24].mxu1 %vm512_vm0, %v1181_v26 }
 0x15e   : > { %3538 = vmatmul.mubr.msk.f32.gmra.mrb[24].mxu0 %vm512_vm0, %v956_v27 }
 0x160   : > { %v1182_v28 = vpop.trf.xlu1 }
 0x161   : > { %v957_v29 = vpop.trf.xlu0  ;;  %3572 = vmatprep.mubr.msk.f32.mxu1 %vm512_vm0, %v1182_v28 }
 0x162   : > { %3540 = vmatprep.mubr.msk.f32.mxu0 %vm512_vm0, %v957_v29 }
 0x164   : > { %v1183_v30 = vpop.trf.xlu1 }
 0x165   : > { %v958_v31 = vpop.trf.xlu0  ;;  %3573 = vmatmul.mubr.msk.f32.gmra.mrb[26].mxu1 %vm512_vm0, %v1183_v30 }
 0x166   : > { %3541 = vmatmul.mubr.msk.f32.gmra.mrb[26].mxu0 %vm512_vm0, %v958_v31 }
 0x168   : > { %v1184_v32 = vpop.trf.xlu1 }
 0x169   : > { %v959_v33 = vpop.trf.xlu0  ;;  %3575 = vmatprep.mubr.msk.f32.mxu1 %vm512_vm0, %v1184_v32 }
 0x16a   : > { %3543 = vmatprep.mubr.msk.f32.mxu0 %vm512_vm0, %v959_v33 }
 0x16c   : > { %v1185_v34 = vpop.trf.xlu1 }
 0x16d   : > { %v960_v35 = vpop.trf.xlu0  ;;  %3576 = vmatmul.mubr.msk.f32.gmra.mrb[28].mxu1 %vm512_vm0, %v1185_v34 }
 0x16e   : > { %3544 = vmatmul.mubr.msk.f32.gmra.mrb[28].mxu0 %vm512_vm0, %v960_v35 }
 0x170   : > { %v1186_v36 = vpop.trf.xlu1 }
 0x171   : > { %v961_v37 = vpop.trf.xlu0  ;;  %3578 = vmatprep.mubr.msk.f32.mxu1 %vm512_vm0, %v1186_v36 }
 0x172   : > { %3546 = vmatprep.mubr.msk.f32.mxu0 %vm512_vm0, %v961_v37 }
 0x174   : > { %v1187_v38 = vpop.trf.xlu1 }
 0x175   : > { %v962_v39 = vpop.trf.xlu0  ;;  %3579 = vmatmul.mubr.msk.f32.gmra.mrb[30].mxu1 %vm512_vm0, %v1187_v38 }
 0x176   : > { %3547 = vmatmul.mubr.msk.f32.gmra.mrb[30].mxu0 %vm512_vm0, %v962_v39  ;;  %3651 = vmatprep.mubr.f32.mxu1 (!%p3141_p7), %v5028_v45 }
 0x177   : > { %3613 = vmatprep.mubr.f32.mxu0 (!%p3141_p7), %v5016_v40 }
 0x1d0   : > { %v5139_v47 = vpop.f32.mrb[0].mxu1 }
 0x1d1   : > { %v5137_v43 = vpop.f32.mrb[0].mxu0  ;;  %v5143_v59 = vpop.f32.mrb[1].mxu1 }
 0x1d2   : > { %v5141_v48 = vpop.f32.mrb[1].mxu0  ;;  %v1402_v61 = vmax.f32 %v5143_v59, %v5139_v47 }
 0x1d3   : > { %v1381_v60 = vmax.f32 %v5141_v48, %v5137_v43 }
 0x1d8   : > { %v5151_v63 = vpop.f32.mrb[2].mxu1 }
 0x1d9   : > { %v5149_v62 = vpop.f32.mrb[2].mxu0  ;;  %5935 = vst [vmem:[#allocation47_spill] sm:$0xff] %v5151_v63  ;;  %v5155_v1 = vpop.f32.mrb[3].mxu1 }
 0x1da   : > { %5934 = vst [vmem:[#allocation46_spill] sm:$0xff] %v5149_v62  ;;  %v5153_v0 = vpop.f32.mrb[3].mxu0  ;;  %5937 = vst [vmem:[#allocation49_spill] sm:$0xff] %v5155_v1  ;;  %v1403_v3 = vmax.f32 %v1402_v61, %v5155_v1 }
 0x1db   : > { %5936 = vst [vmem:[#allocation48_spill] sm:$0xff] %v5153_v0  ;;  %v1382_v2 = vmax.f32 %v1381_v60, %v5153_v0 }
 0x1dc   : > { %v1404_v5 = vmax.f32 %v1403_v3, %v5151_v63 }
 0x1dd   : > { %v1383_v4 = vmax.f32 %v1382_v2, %v5149_v62 }
 0x1e0   : > { %v5163_v7 = vpop.f32.mrb[4].mxu1 }
 0x1e1   : > { %v5161_v6 = vpop.f32.mrb[4].mxu0  ;;  %v5167_v9 = vpop.f32.mrb[5].mxu1 }
 0x1e2   : > { %v5165_v8 = vpop.f32.mrb[5].mxu0  ;;  %v1405_v11 = vmax.f32 %v1404_v5, %v5167_v9 }
 0x1e3   : > { %v1384_v10 = vmax.f32 %v1383_v4, %v5165_v8 }
 0x1e4   : > { %v1406_v13 = vmax.f32 %v1405_v11, %v5163_v7 }
 0x1e5   : > { %v1385_v12 = vmax.f32 %v1384_v10, %v5161_v6 }
 0x1e8   : > { %v5175_v15 = vpop.f32.mrb[6].mxu1 }
 0x1e9   : > { %v5173_v14 = vpop.f32.mrb[6].mxu0  ;;  %v5179_v17 = vpop.f32.mrb[7].mxu1 }
 0x1ea   : > { %5938 = vst [vmem:[#allocation50_spill] sm:$0xff] %v5173_v14  ;;  %v5177_v16 = vpop.f32.mrb[7].mxu0  ;;  %v1407_v19 = vmax.f32 %v1406_v13, %v5179_v17 }
 0x1eb   : > { %v1386_v18 = vmax.f32 %v1385_v12, %v5177_v16 }
 0x1ec   : > { %v1408_v21 = vmax.f32 %v1407_v19, %v5175_v15 }
 0x1ed   : > { %v1387_v20 = vmax.f32 %v1386_v18, %v5173_v14 }
 0x1f0   : > { %v5187_v23 = vpop.f32.mrb[8].mxu1 }
 0x1f1   : > { %v5185_v22 = vpop.f32.mrb[8].mxu0  ;;  %5939 = vst [vmem:[#allocation51_spill] sm:$0xff] %v5187_v23  ;;  %v5191_v25 = vpop.f32.mrb[9].mxu1 }
 0x1f2   : > { %v5189_v24 = vpop.f32.mrb[9].mxu0  ;;  %v1409_v27 = vmax.f32 %v1408_v21, %v5191_v25 }
 0x1f3   : > { %v1388_v26 = vmax.f32 %v1387_v20, %v5189_v24 }
 0x1f4   : > { %v1410_v29 = vmax.f32 %v1409_v27, %v5187_v23 }
 0x1f5   : > { %v1389_v28 = vmax.f32 %v1388_v26, %v5185_v22 }
 0x1f8   : > { %v5199_v31 = vpop.f32.mrb[10].mxu1 }
 0x1f9   : > { %v5197_v30 = vpop.f32.mrb[10].mxu0  ;;  %5941 = vst [vmem:[#allocation53_spill] sm:$0xff] %v5199_v31  ;;  %v5203_v33 = vpop.f32.mrb[11].mxu1 }
 0x1fa   : > { %5940 = vst [vmem:[#allocation52_spill] sm:$0xff] %v5197_v30  ;;  %v5201_v32 = vpop.f32.mrb[11].mxu0  ;;  %5943 = vst [vmem:[#allocation55_spill] sm:$0xff] %v5203_v33  ;;  %v1411_v35 = vmax.f32 %v1410_v29, %v5203_v33 }
 0x1fb   : > { %5942 = vst [vmem:[#allocation54_spill] sm:$0xff] %v5201_v32  ;;  %v1390_v34 = vmax.f32 %v1389_v28, %v5201_v32 }
 0x1fc   : > { %v1412_v37 = vmax.f32 %v1411_v35, %v5199_v31 }
 0x1fd   : > { %v1391_v36 = vmax.f32 %v1390_v34, %v5197_v30 }
 0x200   : > { %v5211_v39 = vpop.f32.mrb[12].mxu1 }
 0x201   : > { %v5209_v38 = vpop.f32.mrb[12].mxu0  ;;  %5945 = vst [vmem:[#allocation57_spill] sm:$0xff] %v5211_v39  ;;  %v5215_v61 = vpop.f32.mrb[13].mxu1 }
 0x202   : > { %5944 = vst [vmem:[#allocation56_spill] sm:$0xff] %v5209_v38  ;;  %v5213_v60 = vpop.f32.mrb[13].mxu0  ;;  %5947 = vst [vmem:[#allocation59_spill] sm:$0xff] %v5215_v61  ;;  %v1413_v3 = vmax.f32 %v1412_v37, %v5215_v61 }
 0x203   : > { %5946 = vst [vmem:[#allocation58_spill] sm:$0xff] %v5213_v60  ;;  %v1392_v2 = vmax.f32 %v1391_v36, %v5213_v60 }
 0x204   : > { %v1414_v5 = vmax.f32 %v1413_v3, %v5211_v39 }
 0x205   : > { %v1393_v4 = vmax.f32 %v1392_v2, %v5209_v38 }
 0x208   : > { %v5223_v11 = vpop.f32.mrb[14].mxu1 }
 0x209   : > { %v5221_v10 = vpop.f32.mrb[14].mxu0  ;;  %v5227_v13 = vpop.f32.mrb[15].mxu1 }
 0x20a   : > { %5948 = vst [vmem:[#allocation60_spill] sm:$0xff] %v5221_v10  ;;  %v5225_v12 = vpop.f32.mrb[15].mxu0  ;;  %5949 = vst [vmem:[#allocation61_spill] sm:$0xff] %v5227_v13  ;;  %v1415_v19 = vmax.f32 %v1414_v5, %v5227_v13 }
 0x20b   : > { %v1394_v18 = vmax.f32 %v1393_v4, %v5225_v12 }
 0x20c   : > { %v1416_v21 = vmax.f32 %v1415_v19, %v5223_v11 }
 0x20d   : > { %v1395_v20 = vmax.f32 %v1394_v18, %v5221_v10 }
 0x20e   : > { %v1417_v27 = vrot.slane %v1416_v21, 4 }
 0x20f   : > { %v1396_v26 = vrot.slane %v1395_v20, 4 }
 0x210   : > { %v1418_v29 = vmax.f32 %v1416_v21, %v1417_v27  ;;  %v5235_v35 = vpop.f32.mrb[16].mxu1 }
 0x211   : > { %v1397_v28 = vmax.f32 %v1395_v20, %v1396_v26  ;;  %v5233_v34 = vpop.f32.mrb[16].mxu0  ;;  %v5239_v37 = vpop.f32.mrb[17].mxu1 }
 0x212   : > { %v5237_v36 = vpop.f32.mrb[17].mxu0  ;;  %v1419_v3 = vrot.slane %v1418_v29, 2  ;;  %v1444_v5 = vmax.f32 %v5239_v37, %v5235_v35 }
 0x213   : > { %v1398_v2 = vrot.slane %v1397_v28, 2  ;;  %v1423_v4 = vmax.f32 %v5237_v36, %v5233_v34 }
 0x214   : > { %v1420_v19 = vmax.f32 %v1418_v29, %v1419_v3 }
 0x215   : > { %v1399_v18 = vmax.f32 %v1397_v28, %v1398_v2 }
 0x216   : > { %v1421_v21 = vrot.slane %v1420_v19, 1 }
 0x217   : > { %v1400_v20 = vrot.slane %v1399_v18, 1 }
 0x218   : > { %v5247_v27 = vmax.f32 %v1420_v19, %v1421_v21  ;;  %v5251_v54 = vpop.f32.mrb[18].mxu1 }
 0x219   : > { %v5245_v26 = vmax.f32 %v1399_v18, %v1400_v20  ;;  %v5249_v58 = vpop.f32.mrb[18].mxu0  ;;  %5950 = vst [vmem:[#allocation62_spill] sm:$0xff] %v5251_v54  ;;  %v5255_v56 = vpop.f32.mrb[19].mxu1 }
 0x21a   : > { %v5253_v57 = vpop.f32.mrb[19].mxu0  ;;  %5951 = vst [vmem:[#allocation63_spill] sm:$0xff] %v5255_v56  ;;  %v1445_v52 = vmax.f32 %v1444_v5, %v5255_v56  ;;  %2105 = vst [vmem:[#allocation2 + $0x1] sm:$0x1] (!%p3141_p7), %v5247_v27 }
 0x21b   : > { %v1424_v53 = vmax.f32 %v1423_v4, %v5253_v57  ;;  %2104 = vst [vmem:[#allocation2] sm:$0x1] (!%p3141_p7), %v5245_v26 }
 0x21c   : > { %v1446_v29 = vmax.f32 %v1445_v52, %v5251_v54 }
 0x21d   : > { %v1425_v28 = vmax.f32 %v1424_v53, %v5249_v58 }
 0x220   : > { %v5263_v3 = vpop.f32.mrb[20].mxu1 }
 0x221   : > { %v5261_v2 = vpop.f32.mrb[20].mxu0  ;;  %5953 = vst [vmem:[#allocation65_spill] sm:$0xff] %v5263_v3  ;;  %v5267_v19 = vpop.f32.mrb[21].mxu1 }
 0x222   : > { %5952 = vst [vmem:[#allocation64_spill] sm:$0xff] %v5261_v2  ;;  %v5265_v18 = vpop.f32.mrb[21].mxu0  ;;  %5955 = vst [vmem:[#allocation67_spill] sm:$0xff] %v5267_v19  ;;  %v1447_v21 = vmax.f32 %v1446_v29, %v5267_v19 }
 0x223   : > { %5954 = vst [vmem:[#allocation66_spill] sm:$0xff] %v5265_v18  ;;  %v1426_v20 = vmax.f32 %v1425_v28, %v5265_v18 }
 0x224   : > { %v1448_v5 = vmax.f32 %v1447_v21, %v5263_v3 }
 0x225   : > { %v1427_v4 = vmax.f32 %v1426_v20, %v5261_v2 }
 0x228   : > { %v5275_v53 = vpop.f32.mrb[22].mxu1 }
 0x229   : > { %v5273_v55 = vpop.f32.mrb[22].mxu0  ;;  %5957 = vst [vmem:[#allocation69_spill] sm:$0xff] %v5275_v53  ;;  %v5279_v50 = vpop.f32.mrb[23].mxu1 }
 0x22a   : > { %5956 = vst [vmem:[#allocation68_spill] sm:$0xff] %v5273_v55  ;;  %v5277_v52 = vpop.f32.mrb[23].mxu0  ;;  %5959 = vst [vmem:[#allocation71_spill] sm:$0xff] %v5279_v50  ;;  %v1449_v44 = vmax.f32 %v1448_v5, %v5279_v50 }
 0x22b   : > { %5958 = vst [vmem:[#allocation70_spill] sm:$0xff] %v5277_v52  ;;  %v1428_v51 = vmax.f32 %v1427_v4, %v5277_v52 }
 0x22c   : > { %v1450_v29 = vmax.f32 %v1449_v44, %v5275_v53 }
 0x22d   : > { %v1429_v28 = vmax.f32 %v1428_v51, %v5273_v55 }
 0x230   : > { %v5287_v20 = vpop.f32.mrb[24].mxu1 }
 0x231   : > { %v5285_v49 = vpop.f32.mrb[24].mxu0  ;;  %5961 = vst [vmem:[#allocation73_spill] sm:$0xff] %v5287_v20  ;;  %v5291_v46 = vpop.f32.mrb[25].mxu1 }
 0x232   : > { %5960 = vst [vmem:[#allocation72_spill] sm:$0xff] %v5285_v49  ;;  %v5289_v21 = vpop.f32.mrb[25].mxu0  ;;  %5963 = vst [vmem:[#allocation75_spill] sm:$0xff] %v5291_v46  ;;  %v1451_v41 = vmax.f32 %v1450_v29, %v5291_v46 }
 0x233   : > { %5962 = vst [vmem:[#allocation74_spill] sm:$0xff] %v5289_v21  ;;  %v1430_v42 = vmax.f32 %v1429_v28, %v5289_v21 }
 0x234   : > { %v1452_v5 = vmax.f32 %v1451_v41, %v5287_v20 }
 0x235   : > { %v1431_v4 = vmax.f32 %v1430_v42, %v5285_v49 }
 0x238   : > { %v5299_v51 = vpop.f32.mrb[26].mxu1 }
 0x239   : > { %v5297_v50 = vpop.f32.mrb[26].mxu0  ;;  %5965 = vst [vmem:[#allocation77_spill] sm:$0xff] %v5299_v51  ;;  %v5303_v53 = vpop.f32.mrb[27].mxu1 }
 0x23a   : > { %5964 = vst [vmem:[#allocation76_spill] sm:$0xff] %v5297_v50  ;;  %v5301_v44 = vpop.f32.mrb[27].mxu0  ;;  %5967 = vst [vmem:[#allocation79_spill] sm:$0xff] %v5303_v53  ;;  %v1453_v52 = vmax.f32 %v1452_v5, %v5303_v53 }
 0x23b   : > { %5966 = vst [vmem:[#allocation78_spill] sm:$0xff] %v5301_v44  ;;  %v1432_v55 = vmax.f32 %v1431_v4, %v5301_v44 }
 0x23c   : > { %v1454_v29 = vmax.f32 %v1453_v52, %v5299_v51 }
 0x23d   : > { %v1433_v28 = vmax.f32 %v1432_v55, %v5297_v50 }
 0x240   : > { %v5311_v42 = vpop.f32.mrb[28].mxu1 }
 0x241   : > { %v5309_v46 = vpop.f32.mrb[28].mxu0  ;;  %5969 = vst [vmem:[#allocation81_spill] sm:$0xff] %v5311_v42  ;;  %v5315_v20 = vpop.f32.mrb[29].mxu1 }
 0x242   : > { %5968 = vst [vmem:[#allocation80_spill] sm:$0xff] %v5309_v46  ;;  %v5313_v41 = vpop.f32.mrb[29].mxu0  ;;  %5971 = vst [vmem:[#allocation83_spill] sm:$0xff] %v5315_v20  ;;  %v1455_v21 = vmax.f32 %v1454_v29, %v5315_v20 }
 0x243   : > { %5970 = vst [vmem:[#allocation82_spill] sm:$0xff] %v5313_v41  ;;  %v1434_v49 = vmax.f32 %v1433_v28, %v5313_v41 }
 0x244   : > { %v1456_v5 = vmax.f32 %v1455_v21, %v5311_v42 }
 0x245   : > { %v1435_v4 = vmax.f32 %v1434_v49, %v5309_v46 }
 0x248   : > { %v5323_v55 = vpop.f32.mrb[30].mxu1 }
 0x249   : > { %v5321_v53 = vpop.f32.mrb[30].mxu0  ;;  %v5327_v51 = vpop.f32.mrb[31].mxu1 }
 0x24a   : > { %v5325_v52 = vpop.f32.mrb[31].mxu0  ;;  %v1457_v44 = vmax.f32 %v1456_v5, %v5327_v51  ;;  %v1472_v5 = vsub.f32 (!%p3141_p7), %v5165_v8, %v5245_v26 }
 0x24b   : > { %v1436_v50 = vmax.f32 %v1435_v4, %v5325_v52 }
 0x24c   : > { %v1458_v29 = vmax.f32 %v1457_v44, %v5323_v55  ;;  %v1484_v44 = vsub.f32 (!%p3141_p7), %v5143_v59, %v5247_v27 }
 0x24d   : > { %v1437_v28 = vmax.f32 %v1436_v50, %v5321_v53  ;;  %v1468_v50 = vsub.f32 (!%p3141_p7), %v5141_v48, %v5245_v26 }
 0x24e   : > { %v1459_v49 = vrot.slane %v1458_v29, 4  ;;  %v1564_v4 = vmul.f32 (!%p3141_p7), 1.442695, %v1484_v44  ;;  %v1474_v44 = vsub.f32 (!%p3141_p7), %v5177_v16, %v5245_v26 }
 0x24f   : > { %v1438_v20 = vrot.slane %v1437_v28, 4 }
 0x250   : > { %v1460_v21 = vmax.f32 %v1458_v29, %v1459_v49 }
 0x251   : > { %v1439_v46 = vmax.f32 %v1437_v28, %v1438_v20  ;;  %v1469_v20 = vsub.f32 (!%p3141_p7), %v5137_v43, %v5245_v26 }
 0x252   : > { %v1461_v41 = vrot.slane %v1460_v21, 2 }
 0x253   : > { %v1440_v42 = vrot.slane %v1439_v46, 2  ;;  %1467 = sbr.rel (%p3141_p7) target bundleno = 903 (0x387), region = 52 }
 0x254   : > { %v1462_v19 = vmax.f32 %v1460_v21, %v1461_v41  ;;  %v1534_v41 = vmul.f32 (!%p3141_p7), 1.442695, %v1469_v20  ;;  %v1473_v21 = vsub.f32 (!%p3141_p7), %v5161_v6, %v5245_v26  ;;  %v1489_v20 = vsub.f32 (!%p3141_p7), %v5163_v7, %v5247_v27 }
 0x255   : > { %v1441_v3 = vmax.f32 %v1439_v46, %v1440_v42  ;;  %v1485_v46 = vsub.f32 (!%p3141_p7), %v5139_v47, %v5247_v27  ;;  %v1532_v42 = vmul.f32 (!%p3141_p7), 1.442695, %v1468_v50  ;;  %v1488_v50 = vsub.f32 (!%p3141_p7), %v5167_v9, %v5247_v27 }
 0x256   : > { %v1463_v18 = vrot.slane %v1462_v19, 1 }
 0x257   : > { %v1442_v2 = vrot.slane %v1441_v3, 1  ;;  %v1566_v28 = vmul.f32 (!%p3141_p7), 1.442695, %v1485_v46  ;;  %4320 = vpow2.f32 (!%p3141_p7), %v1532_v42  ;;  %v1475_v46 = vsub.f32 (!%p3141_p7), %v5173_v14, %v5245_v26 }
 0x258   : > { %v5335_v56 = vmax.f32 %v1462_v19, %v1463_v18  ;;  %v1486_v18 = vsub.f32 (!%p3141_p7), %v5155_v1, %v5247_v27  ;;  %v1487_v19 = vsub.f32 (!%p3141_p7), %v5151_v63, %v5247_v27  ;;  %4322 = vpow2.f32 (!%p3141_p7), %v1534_v41 }
 0x259   : > { %v5333_v54 = vmax.f32 %v1441_v3, %v1442_v2  ;;  %v1470_v2 = vsub.f32 (!%p3141_p7), %v5153_v0, %v5245_v26  ;;  %v1471_v3 = vsub.f32 (!%p3141_p7), %v5149_v62, %v5245_v26  ;;  %v1540_v0 = vmul.f32 (!%p3141_p7), 1.442695, %v1472_v5 }
 0x25a   : > { %2107 = vst [vmem:[#allocation2 + $0x3] sm:$0x1] %v5335_v56  ;;  %v1568_v62 = vmul.f32 1.442695, %v1486_v18  ;;  %v1570_v1 = vmul.f32 1.442695, %v1487_v19  ;;  %4324 = vpow2.f32 %v1564_v4  ;;  %v1491_v19 = vsub.f32 %v5175_v15, %v5247_v27 }
 0x25b   : > { %2106 = vst [vmem:[#allocation2 + $0x2] sm:$0x1] %v5333_v54  ;;  %v1536_v29 = vmul.f32 1.442695, %v1470_v2  ;;  %v1538_v49 = vmul.f32 1.442695, %v1471_v3  ;;  %v1490_v2 = vsub.f32 %v5179_v17, %v5247_v27  ;;  %4326 = vpow2.f32 %v1566_v28 }
 0x25c   : > { %v1542_v63 = vmul.f32 1.442695, %v1473_v21  ;;  %v1572_v3 = vmul.f32 1.442695, %v1488_v50  ;;  %v1574_v18 = vmul.f32 1.442695, %v1489_v20  ;;  %v1476_v21 = vsub.f32 %v5189_v24, %v5245_v26 }
 0x25d   : > { %4328 = vpow2.f32 %v1536_v29  ;;  %v1544_v42 = vmul.f32 1.442695, %v1474_v44  ;;  %v1546_v41 = vmul.f32 1.442695, %v1475_v46  ;;  %v1576_v5 = vmul.f32 1.442695, %v1490_v2 }
 0x25e   : > { %4330 = vpow2.f32 %v1538_v49  ;;  %v1578_v4 = vmul.f32 1.442695, %v1491_v19  ;;  %v1477_v14 = vsub.f32 %v5185_v22, %v5245_v26  ;;  %v1492_v28 = vsub.f32 %v5191_v25, %v5247_v27 }
 0x25f   : > { %4332 = vpow2.f32 %v1568_v62  ;;  %v1493_v50 = vsub.f32 %v5187_v23, %v5247_v27  ;;  %v1478_v29 = vsub.f32 %v5201_v32, %v5245_v26  ;;  %v1548_v20 = vmul.f32 1.442695, %v1476_v21 }
 0x260   : > { %4334 = vpow2.f32 %v1570_v1  ;;  %v1550_v49 = vmul.f32 1.442695, %v1477_v14  ;;  %v1479_v44 = vsub.f32 %v5197_v30, %v5245_v26  ;;  %v1580_v46 = vmul.f32 1.442695, %v1492_v28 }
 0x261   : > { %4336 = vpow2.f32 %v1540_v0  ;;  %v1582_v2 = vmul.f32 1.442695, %v1493_v50  ;;  %v5389_v19 = vmul.f32 1.442695, %v1478_v29  ;;  %v1494_v23 = vsub.f32 %v5203_v33, %v5247_v27  ;;  %v4321_v1 = vpop.eup %4320 }
 0x262   : > { %4338 = vpow2.f32 %v1542_v63  ;;  %v5391_v62 = vmul.f32 1.442695, %v1479_v44  ;;  %v1495_v32 = vsub.f32 %v5199_v31, %v5247_v27  ;;  %v1480_v14 = vsub.f32 %v5213_v60, %v5245_v26  ;;  %v4323_v63 = vpop.eup %4322 }
 0x263   : > { %4340 = vpow2.f32 %v1572_v3  ;;  %v1481_v0 = vsub.f32 %v5209_v38, %v5245_v26  ;;  %v1496_v21 = vsub.f32 %v5215_v61, %v5247_v27  ;;  %v5403_v28 = vmul.f32 1.442695, %v1494_v23 }
 0x264   : > { %4342 = vpow2.f32 %v1574_v18  ;;  %v5405_v50 = vmul.f32 1.442695, %v1495_v32  ;;  %v1497_v29 = vsub.f32 %v5211_v39, %v5247_v27  ;;  %v4325_v44 = vpop.eup %4324  ;;  %v1660_v3 = vadd.f32 %v4323_v63, %v4321_v1 }
 0x265   : > { %v3917_v31 = vpack.c.bf16 %v4323_v63, %v4321_v1  ;;  %4344 = vpow2.f32 %v1544_v42  ;;  %v5409_v60 = vmul.f32 1.442695, %v1480_v14  ;;  %v4327_v33 = vpop.eup %4326  ;;  %v5411_v38 = vmul.f32 1.442695, %v1481_v0 }
 0x266   : > { %4346 = vpow2.f32 %v1546_v41  ;;  %v5413_v61 = vmul.f32 1.442695, %v1496_v21  ;;  %v5415_v18 = vmul.f32 1.442695, %v1497_v29  ;;  %v1681_v32 = vadd.f32 %v4327_v33, %v4325_v44 }
 0x267   : > { %v4329_v23 = vpop.eup %4328  ;;  %3918 = vmatprep.subr.bf16.mxu0 %v3917_v31  ;;  %v3949_v30 = vpack.c.bf16 %v4327_v33, %v4325_v44  ;;  %4348 = vpow2.f32 %v1576_v5  ;;  %v1482_v39 = vsub.f32 %v5225_v12, %v5245_v26  ;;  %v1483_v41 = vsub.f32 %v5221_v10, %v5245_v26 }
 0x268   : > { %v4331_v1 = vpop.eup %4330  ;;  %3920 = vmatpush3.bf16.msra.mxu0 %v3917_v31  ;;  %v1661_v42 = vadd.f32 %v4329_v23, %v1660_v3  ;;  %4350 = vpow2.f32 %v1578_v4  ;;  %v1498_v14 = vsub.f32 %v5227_v13, %v5247_v27  ;;  %v1499_v33 = vsub.f32 %v5223_v11, %v5247_v27 }
 0x269   : > { %v4333_v0 = vpop.eup %4332  ;;  %3950 = vmatprep.subr.bf16.mxu1 %v3949_v30  ;;  %v3921_v21 = vpack.c.bf16 %v4331_v1, %v4329_v23  ;;  %4352 = vpow2.f32 %v1548_v20  ;;  %v5423_v63 = vmul.f32 1.442695, %v1482_v39  ;;  %v5427_v4 = vmul.f32 1.442695, %v1483_v41 }
 0x26a   : > { %v4335_v5 = vpop.eup %4334  ;;  %3952 = vmatpush3.bf16.msra.mxu1 %v3949_v30  ;;  %v1662_v31 = vadd.f32 %v4331_v1, %v1661_v42  ;;  %v1682_v29 = vadd.f32 %v4333_v0, %v1681_v32  ;;  %4354 = vpow2.f32 %v1550_v49  ;;  %v5429_v13 = vmul.f32 1.442695, %v1498_v14 }
 0x26b   : > { %v4337_v44 = vpop.eup %4336  ;;  %3922 = vmatprep.subr.bf16.mxu0 %v3921_v21  ;;  %v3953_v3 = vpack.c.bf16 %v4335_v5, %v4333_v0  ;;  %4356 = vpow2.f32 %v1580_v46  ;;  %v5431_v23 = vmul.f32 1.442695, %v1499_v33  ;;  %v1500_v30 = vsub.f32 %v5237_v36, %v5333_v54 }
 0x26c   : > { %v4339_v39 = vpop.eup %4338  ;;  %v1683_v20 = vadd.f32 %v4335_v5, %v1682_v29  ;;  %3924 = vmatpush3.bf16.msra.mxu0 %v3921_v21  ;;  %v1663_v10 = vadd.f32 %v4337_v44, %v1662_v31  ;;  %4358 = vpow2.f32 %v1582_v2  ;;  %v1501_v46 = vsub.f32 %v5233_v34, %v5333_v54 }
 0x26d   : > { %v4341_v32 = vpop.eup %4340  ;;  %3954 = vmatprep.subr.bf16.mxu1 %v3953_v3  ;;  %v3925_v49 = vpack.c.bf16 %v4339_v39, %v4337_v44  ;;  %4360 = vpow2.f32 %v5389_v19  ;;  %v1516_v1 = vsub.f32 %v5239_v37, %v5335_v56  ;;  %v5441_v2 = vmul.f32 1.442695, %v1500_v30 }
 0x26e   : > { %v4343_v42 = vpop.eup %4342  ;;  %3956 = vmatpush3.bf16.msra.mxu1 %v3953_v3  ;;  %v1664_v41 = vadd.f32 %v4339_v39, %v1663_v10  ;;  %v1684_v14 = vadd.f32 %v4341_v32, %v1683_v20  ;;  %4362 = vpow2.f32 %v5391_v62  ;;  %v5444_v19 = vmul.f32 1.442695, %v1501_v46  ;;  %v5972_v46 = vld [vmem:[#allocation63_spill] sm:$0xff] }
 0x26f   : > { %v4345_v0 = vpop.eup %4344  ;;  %3926 = vmatprep.subr.bf16.mxu0 %v3925_v49  ;;  %v3957_v21 = vpack.c.bf16 %v4343_v42, %v4341_v32  ;;  %4364 = vpow2.f32 %v5403_v28  ;;  %v1517_v33 = vsub.f32 %v5235_v35, %v5335_v56  ;;  %v5449_v10 = vmul.f32 1.442695, %v1516_v1 }
 0x270   : > { %v4347_v5 = vpop.eup %4346  ;;  %v1685_v31 = vadd.f32 %v4343_v42, %v1684_v14  ;;  %3928 = vmatpush3.bf16.msra.mxu0 %v3925_v49  ;;  %v1665_v29 = vadd.f32 %v4345_v0, %v1664_v41  ;;  %4366 = vpow2.f32 %v5405_v50  ;;  %v1502_v28 = vsub.f32 %v5253_v57, %v5333_v54 }
 0x271   : > { %v4349_v62 = vpop.eup %4348  ;;  %3958 = vmatprep.subr.bf16.mxu1 %v3957_v21  ;;  %v3929_v44 = vpack.c.bf16 %v4347_v5, %v4345_v0  ;;  %4368 = vpow2.f32 %v5409_v60  ;;  %v5452_v3 = vmul.f32 1.442695, %v1517_v33  ;;  %v1503_v50 = vsub.f32 %v5249_v58, %v5333_v54  ;;  %v5973_v33 = vld [vmem:[#allocation62_spill] sm:$0xff] }
 0x272   : > { %v4351_v39 = vpop.eup %4350  ;;  %3960 = vmatpush3.bf16.msra.mxu1 %v3957_v21  ;;  %v1666_v20 = vadd.f32 %v4347_v5, %v1665_v29  ;;  %v1686_v30 = vadd.f32 %v4349_v62, %v1685_v31  ;;  %4370 = vpow2.f32 %v5411_v38  ;;  %v1600_v60 = vmul.f32 1.442695, %v1502_v28 }
 0x273   : > { %v4353_v32 = vpop.eup %4352  ;;  %3930 = vmatprep.subr.bf16.mxu0 %v3929_v44  ;;  %v3961_v49 = vpack.c.bf16 %v4351_v39, %v4349_v62  ;;  %4372 = vpow2.f32 %v5413_v61  ;;  %v1518_v1 = vsub.f32 %v5972_v46, %v5335_v56  ;;  %v1602_v0 = vmul.f32 1.442695, %v1503_v50 }
 0x274   : > { %v4355_v42 = vpop.eup %4354  ;;  %v1687_v41 = vadd.f32 %v4351_v39, %v1686_v30  ;;  %3932 = vmatpush3.bf16.msra.mxu0 %v3929_v44  ;;  %v1667_v14 = vadd.f32 %v4353_v32, %v1666_v20  ;;  %4374 = vpow2.f32 %v5415_v18  ;;  %v1519_v5 = vsub.f32 %v5973_v33, %v5335_v56  ;;  %v5974_v44 = vld [vmem:[#allocation66_spill] sm:$0xff] }
 0x275   : > { %v4357_v38 = vpop.eup %4356  ;;  %3962 = vmatprep.subr.bf16.mxu1 %v3961_v49  ;;  %v3933_v21 = vpack.c.bf16 %v4355_v42, %v4353_v32  ;;  %4376 = vpow2.f32 %v5423_v63  ;;  %v1632_v61 = vmul.f32 1.442695, %v1518_v1  ;;  %v1504_v28 = vsub.f32 %v5974_v44, %v5333_v54  ;;  %v5975_v63 = vld [vmem:[#allocation64_spill] sm:$0xff] }
 0x276   : > { %v4359_v31 = vpop.eup %4358  ;;  %3964 = vmatpush3.bf16.msra.mxu1 %v3961_v49  ;;  %v1668_v29 = vadd.f32 %v4355_v42, %v1667_v14  ;;  %v1688_v62 = vadd.f32 %v4357_v38, %v1687_v41  ;;  %4378 = vpow2.f32 %v5427_v4  ;;  %v1634_v20 = vmul.f32 1.442695, %v1519_v5  ;;  %v5976_v41 = vld [vmem:[#allocation67_spill] sm:$0xff] }
 0x277   : > { %v4361_v18 = vpop.eup %4360  ;;  %3934 = vmatprep.subr.bf16.mxu0 %v3933_v21  ;;  %v3965_v39 = vpack.c.bf16 %v4359_v31, %v4357_v38  ;;  %4380 = vpow2.f32 %v5429_v13  ;;  %v1505_v30 = vsub.f32 %v5975_v63, %v5333_v54  ;;  %v1604_v46 = vmul.f32 1.442695, %v1504_v28 }
 0x278   : > { %v4363_v50 = vpop.eup %4362  ;;  %v1689_v32 = vadd.f32 %v4359_v31, %v1688_v62  ;;  %3936 = vmatpush3.bf16.msra.mxu0 %v3933_v21  ;;  %v1669_v49 = vadd.f32 %v4361_v18, %v1668_v29  ;;  %4382 = vpow2.f32 %v5431_v23  ;;  %v1520_v13 = vsub.f32 %v5976_v41, %v5335_v56  ;;  %v5977_v21 = vld [vmem:[#allocation65_spill] sm:$0xff]  ;;  %v5980_v41 = vld [vmem:[#allocation71_spill] sm:$0xff] }
 0x279   : > { %v4365_v4 = vpop.eup %4364  ;;  %3966 = vmatprep.subr.bf16.mxu1 %v3965_v39  ;;  %v3937_v1 = vpack.c.bf16 %v4363_v50, %v4361_v18  ;;  %4384 = vpow2.f32 %v5441_v2  ;;  %v1606_v42 = vmul.f32 1.442695, %v1505_v30  ;;  %v1521_v5 = vsub.f32 %v5977_v21, %v5335_v56  ;;  %v5978_v2 = vld [vmem:[#allocation70_spill] sm:$0xff]  ;;  %v5979_v30 = vld [vmem:[#allocation68_spill] sm:$0xff] }
 0x27a   : > { %v4367_v14 = vpop.eup %4366  ;;  %3968 = vmatpush3.bf16.msra.mxu1 %v3965_v39  ;;  %v1670_v38 = vadd.f32 %v4363_v50, %v1669_v49  ;;  %v1690_v33 = vadd.f32 %v4365_v4, %v1689_v32  ;;  %4386 = vpow2.f32 %v5444_v19  ;;  %v1636_v29 = vmul.f32 1.442695, %v1520_v13 }
 0x27b   : > { %v4369_v23 = vpop.eup %4368  ;;  %3938 = vmatprep.subr.bf16.mxu0 %v3937_v1  ;;  %v3969_v31 = vpack.c.bf16 %v4367_v14, %v4365_v4  ;;  %4388 = vpow2.f32 %v5449_v10  ;;  %v1506_v62 = vsub.f32 %v5978_v2, %v5333_v54  ;;  %v1638_v39 = vmul.f32 1.442695, %v1521_v5 }
 0x27c   : > { %v4371_v44 = vpop.eup %4370  ;;  %v1691_v28 = vadd.f32 %v4367_v14, %v1690_v33  ;;  %3940 = vmatpush3.bf16.msra.mxu0 %v3937_v1  ;;  %v1671_v18 = vadd.f32 %v4369_v23, %v1670_v38  ;;  %4390 = vpow2.f32 %v5452_v3  ;;  %v1507_v50 = vsub.f32 %v5979_v30, %v5333_v54  ;;  %v5981_v38 = vld [vmem:[#allocation69_spill] sm:$0xff] }
 0x27d   : > { %v4373_v19 = vpop.eup %4372  ;;  %3970 = vmatprep.subr.bf16.mxu1 %v3969_v31  ;;  %v3941_v63 = vpack.c.bf16 %v4371_v44, %v4369_v23  ;;  %4392 = vpow2.f32 %v1600_v60  ;;  %v1608_v32 = vmul.f32 1.442695, %v1506_v62  ;;  %v1522_v1 = vsub.f32 %v5980_v41, %v5335_v56  ;;  %v5982_v62 = vld [vmem:[#allocation74_spill] sm:$0xff] }
 0x27e   : > { %v4375_v10 = vpop.eup %4374  ;;  %3972 = vmatpush3.bf16.msra.mxu1 %v3969_v31  ;;  %v1672_v49 = vadd.f32 %v4371_v44, %v1671_v18  ;;  %v1692_v4 = vadd.f32 %v4373_v19, %v1691_v28  ;;  %4394 = vpow2.f32 %v1602_v0  ;;  %v1610_v14 = vmul.f32 1.442695, %v1507_v50 }
 0x27f   : > { %v4377_v13 = vpop.eup %4376  ;;  %3942 = vmatprep.subr.bf16.mxu0 %v3941_v63  ;;  %v3973_v3 = vpack.c.bf16 %v4375_v10, %v4373_v19  ;;  %4396 = vpow2.f32 %v1632_v61  ;;  %v1523_v60 = vsub.f32 %v5981_v38, %v5335_v56  ;;  %v1640_v23 = vmul.f32 1.442695, %v1522_v1  ;;  %v5983_v19 = vld [vmem:[#allocation72_spill] sm:$0xff]  ;;  %v5985_v38 = vld [vmem:[#allocation73_spill] sm:$0xff] }
 0x280   : > { %v4379_v33 = vpop.eup %4378  ;;  %v1693_v21 = vadd.f32 %v4375_v10, %v1692_v4  ;;  %3944 = vmatpush3.bf16.msra.mxu0 %v3941_v63  ;;  %v1673_v5 = vadd.f32 %v4377_v13, %v1672_v49  ;;  %4398 = vpow2.f32 %v1634_v20  ;;  %v1508_v44 = vsub.f32 %v5982_v62, %v5333_v54  ;;  %v5984_v10 = vld [vmem:[#allocation75_spill] sm:$0xff]  ;;  %v5986_v62 = vld [vmem:[#allocation32_spill] sm:$0xff] }
 0x281   : > { %v4381_v31 = vpop.eup %4380  ;;  %3974 = vmatprep.subr.bf16.mxu1 %v3973_v3  ;;  %v3945_v0 = vpack.c.bf16 %v4379_v33, %v4377_v13  ;;  %4400 = vpow2.f32 %v1604_v46  ;;  %v1642_v2 = vmul.f32 1.442695, %v1523_v60  ;;  %v1509_v30 = vsub.f32 %v5983_v19, %v5333_v54 }
 0x282   : > { %v4383_v28 = vpop.eup %4382  ;;  %3976 = vmatpush3.bf16.msra.mxu1 %v3973_v3  ;;  %v1674_v61 = vadd.f32 %v4379_v33, %v1673_v5  ;;  %v1694_v18 = vadd.f32 %v4381_v31, %v1693_v21  ;;  %4402 = vpow2.f32 %v1606_v42  ;;  %v1612_v50 = vmul.f32 1.442695, %v1508_v44 }
 0x283   : > { %v4385_v63 = vpop.eup %4384  ;;  %3946 = vmatprep.subr.bf16.mxu0 %v3945_v0  ;;  %v3977_v20 = vpack.c.bf16 %v4383_v28, %v4381_v31  ;;  %4404 = vpow2.f32 %v1636_v29  ;;  %v1524_v46 = vsub.f32 %v5984_v10, %v5335_v56  ;;  %v1614_v1 = vmul.f32 1.442695, %v1509_v30  ;;  %v5987_v30 = vld [vmem:[#allocation33_spill] sm:$0xff] }
 0x284   : > { %v4387_v49 = vpop.eup %4386  ;;  %v1675_v4 = vrot.slane %v1674_v61, 4  ;;  %v1695_v41 = vadd.f32 %v4383_v28, %v1694_v18  ;;  %3948 = vmatpush3.bf16.msra.mxu0 %v3945_v0  ;;  %4406 = vpow2.f32 %v1638_v39  ;;  %v1525_v60 = vsub.f32 %v5985_v38, %v5335_v56 }
 0x285   : > { %v4389_v13 = vpop.eup %4388  ;;  %3978 = vmatprep.subr.bf16.mxu1 %v3977_v20  ;;  %v1702_v42 = vadd.f32 %v4387_v49, %v4385_v63  ;;  %v3981_v3 = vpack.c.bf16 %v4387_v49, %v4385_v63  ;;  %4408 = vpow2.f32 %v1608_v32  ;;  %v1644_v5 = vmul.f32 1.442695, %v1524_v46  ;;  %v5988_v63 = vld [vmem:[#allocation35_spill] sm:$0xff] }
 0x286   : > { %v4391_v33 = vpop.eup %4390  ;;  %v1676_v29 = vadd.f32 %v1675_v4, %v1674_v61  ;;  %v1696_v21 = vrot.slane %v1695_v41, 4  ;;  %3980 = vmatpush3.bf16.msra.mxu1 %v3977_v20  ;;  %4410 = vpow2.f32 %v1610_v14  ;;  %v1646_v44 = vmul.f32 1.442695, %v1525_v60  ;;  %v5989_v20 = vld [vmem:[#allocation78_spill] sm:$0xff] }
 0x287   : > { %v4393_v31 = vpop.eup %4392  ;;  %3614 = vmatmul.mubr.f32.vlgmr.msra.gmra.mrb[0].mxu0 %v5986_v62  ;;  %3982 = vmatprep.subr.bf16.mxu0 %v3981_v3  ;;  %v1723_v39 = vadd.f32 %v4391_v33, %v4389_v13  ;;  %v4013_v0 = vpack.c.bf16 %v4391_v33, %v4389_v13  ;;  %4412 = vpow2.f32 %v1640_v23  ;;  %v1510_v10 = vsub.f32 %v5989_v20, %v5333_v54  ;;  %v5990_v23 = vld [vmem:[#allocation76_spill] sm:$0xff]  ;;  %v5992_v33 = vld [vmem:[#allocation34_spill] sm:$0xff] }
 0x288   : > { %v4395_v28 = vpop.eup %4394  ;;  %v1677_v18 = vrot.slane %v1676_v29, 2  ;;  %v1697_v32 = vadd.f32 %v1696_v21, %v1695_v41  ;;  %3984 = vmatpush3.bf16.msra.mxu0 %v3981_v3  ;;  %v1703_v19 = vadd.f32 %v4393_v31, %v1702_v42  ;;  %4414 = vpow2.f32 %v1642_v2  ;;  %3616 = vmatprep.mubr.f32.mxu0 %v5987_v30  ;;  %v5991_v42 = vld [vmem:[#allocation36_spill] sm:$0xff] }
 0x289   : > { %v4397_v61 = vpop.eup %4396  ;;  %3652 = vmatmul.mubr.f32.vlgmr.msra.gmra.mrb[0].mxu1 %v5988_v63  ;;  %4014 = vmatprep.subr.bf16.mxu1 %v4013_v0  ;;  %v3985_v14 = vpack.c.bf16 %v4395_v28, %v4393_v31  ;;  %4416 = vpow2.f32 %v1612_v50  ;;  %v1511_v46 = vsub.f32 %v5990_v23, %v5333_v54  ;;  %v1616_v60 = vmul.f32 1.442695, %v1510_v10  ;;  %v5996_v63 = vld [vmem:[#allocation37_spill] sm:$0xff] }
 0x28a   : > { %v4399_v49 = vpop.eup %4398  ;;  %v1678_v4 = vadd.f32 %v1677_v18, %v1676_v29  ;;  %v1698_v41 = vrot.slane %v1697_v32, 2  ;;  %4016 = vmatpush3.bf16.msra.mxu1 %v4013_v0  ;;  %v1704_v13 = vadd.f32 %v4395_v28, %v1703_v19  ;;  %v1724_v2 = vadd.f32 %v4397_v61, %v1723_v39  ;;  %3654 = vmatprep.mubr.f32.mxu1 %v5991_v42  ;;  %v5993_v18 = vld [vmem:[#allocation38_spill] sm:$0xff]  ;;  %v5994_v28 = vld [vmem:[#allocation79_spill] sm:$0xff] }
 0x28b   : > { %v4401_v3 = vpop.eup %4400  ;;  %3986 = vmatprep.subr.bf16.mxu0 %v3985_v14  ;;  %v4017_v38 = vpack.c.bf16 %v4399_v49, %v4397_v61  ;;  %4418 = vpow2.f32 %v1614_v1  ;;  %v1618_v50 = vmul.f32 1.442695, %v1511_v46  ;;  %3617 = vmatmul.mubr.f32.gmra.mrb[2].mxu0 %v5992_v33  ;;  %v1526_v19 = vsub.f32 %v5994_v28, %v5335_v56  ;;  %v5995_v1 = vld [vmem:[#allocation77_spill] sm:$0xff]  ;;  %v5997_v46 = vld [vmem:[#allocation42_spill] sm:$0xff] }
 0x28c   : > { %v4403_v21 = vpop.eup %4402  ;;  %v1679_v31 = vrot.slane %v1678_v4, 1  ;;  %v1699_v62 = vadd.f32 %v1698_v41, %v1697_v32  ;;  %v1725_v30 = vadd.f32 %v4399_v49, %v1724_v2  ;;  %3988 = vmatpush3.bf16.msra.mxu0 %v3985_v14  ;;  %v1705_v29 = vadd.f32 %v4401_v3, %v1704_v13  ;;  %3689 = vmatprep.mubr.f32.mxu0 %v5993_v18 }
 0x28d   : > { %v4405_v0 = vpop.eup %4404  ;;  %4018 = vmatprep.subr.bf16.mxu1 %v4017_v38  ;;  %v3989_v39 = vpack.c.bf16 %v4403_v21, %v4401_v3  ;;  %4420 = vpow2.f32 %v1644_v5  ;;  %v1527_v61 = vsub.f32 %v5995_v1, %v5335_v56  ;;  %3655 = vmatmul.mubr.f32.gmra.mrb[2].mxu1 %v5996_v63  ;;  %v1648_v5 = vmul.f32 1.442695, %v1526_v19  ;;  %v6001_v63 = vld [vmem:[#allocation81_spill] sm:$0xff] }
 0x28e   : > { %v4407_v20 = vpop.eup %4406  ;;  %v1680_v10 = vadd.f32 %v1679_v31, %v1678_v4  ;;  %v1700_v32 = vrot.slane %v1699_v62, 1  ;;  %4020 = vmatpush3.bf16.msra.mxu1 %v4017_v38  ;;  %v1706_v14 = vadd.f32 %v4403_v21, %v1705_v29  ;;  %v1726_v23 = vadd.f32 %v4405_v0, %v1725_v30  ;;  %3727 = vmatprep.mubr.f32.mxu1 %v5997_v46  ;;  %v5998_v21 = vld [vmem:[#allocation82_spill] sm:$0xff]  ;;  %v5999_v30 = vld [vmem:[#allocation80_spill] sm:$0xff] }
 0x28f   : > { %v4409_v49 = vpop.eup %4408  ;;  %3990 = vmatprep.subr.bf16.mxu0 %v3989_v39  ;;  %v4021_v41 = vpack.c.bf16 %v4407_v20, %v4405_v0  ;;  %4422 = vpow2.f32 %v1646_v44  ;;  %v1650_v13 = vmul.f32 1.442695, %v1527_v61  ;;  %v1512_v31 = vsub.f32 %v5998_v21, %v5333_v54 }
 0x290   : > { %v4411_v2 = vpop.eup %4410  ;;  %1744 = vst [vmem:[#allocation3] sm:$0x1] %v1680_v10  ;;  %v1701_v42 = vadd.f32 %v1700_v32, %v1699_v62  ;;  %v1727_v3 = vadd.f32 %v4407_v20, %v1726_v23  ;;  %3992 = vmatpush3.bf16.msra.mxu0 %v3989_v39  ;;  %v1707_v33 = vadd.f32 %v4409_v49, %v1706_v14  ;;  %4424 = vpow2.f32 %v1616_v60  ;;  %v6000_v62 = vld [vmem:[#allocation83_spill] sm:$0xff] }
 0x291   : > { %v4413_v4 = vpop.eup %4412  ;;  %4022 = vmatprep.subr.bf16.mxu1 %v4021_v41  ;;  %v3993_v38 = vpack.c.bf16 %v4411_v2, %v4409_v49  ;;  %4426 = vpow2.f32 %v1618_v50  ;;  %v1513_v29 = vsub.f32 %v5999_v30, %v5333_v54  ;;  %v1528_v39 = vsub.f32 %v6000_v62, %v5335_v56 }
 0x292   : > { %v4415_v44 = vpop.eup %4414  ;;  %1745 = vst [vmem:[#allocation3 + $0x1] sm:$0x1] %v1701_v42  ;;  %4024 = vmatpush3.bf16.msra.mxu1 %v4021_v41  ;;  %v1708_v18 = vadd.f32 %v4411_v2, %v1707_v33  ;;  %v1728_v0 = vadd.f32 %v4413_v4, %v1727_v3  ;;  %4428 = vpow2.f32 %v1648_v5  ;;  %v1620_v50 = vmul.f32 1.442695, %v1512_v31 }
 0x293   : > { %v4417_v60 = vpop.eup %4416  ;;  %3994 = vmatprep.subr.bf16.mxu0 %v3993_v38  ;;  %v4025_v28 = vpack.c.bf16 %v4415_v44, %v4413_v4  ;;  %4430 = vpow2.f32 %v1650_v13  ;;  %v1622_v19 = vmul.f32 1.442695, %v1513_v29  ;;  %v1529_v20 = vsub.f32 %v6001_v63, %v5335_v56 }
 0x294   : > { %v1729_v1 = vadd.f32 %v4415_v44, %v1728_v0  ;;  %3996 = vmatpush3.bf16.msra.mxu0 %v3993_v38  ;;  %v1709_v61 = vadd.f32 %v4417_v60, %v1708_v18  ;;  %v1652_v10 = vmul.f32 1.442695, %v1528_v39  ;;  %4432 = vpow2.f32 %v1620_v50 }
 0x295   : > { %v4419_v32 = vpop.eup %4418  ;;  %4026 = vmatprep.subr.bf16.mxu1 %v4025_v28  ;;  %v1514_v14 = vsub.f32 %v5325_v52, %v5333_v54  ;;  %v1515_v23 = vsub.f32 %v5321_v53, %v5333_v54  ;;  %v1530_v46 = vsub.f32 %v5327_v51, %v5335_v56  ;;  %4434 = vpow2.f32 %v1622_v19 }
 0x296   : > { %4028 = vmatpush3.bf16.msra.mxu1 %v4025_v28  ;;  %v1710_v49 = vadd.f32 %v4419_v32, %v1709_v61  ;;  %v3997_v41 = vpack.c.bf16 %v4419_v32, %v4417_v60  ;;  %v1654_v5 = vmul.f32 1.442695, %v1529_v20  ;;  %4436 = vpow2.f32 %v1652_v10 }
 0x297   : > { %v4421_v13 = vpop.eup %4420  ;;  %v1624_v2 = vmul.f32 1.442695, %v1514_v14  ;;  %v1626_v42 = vmul.f32 1.442695, %v1515_v23  ;;  %v1531_v3 = vsub.f32 %v5323_v55, %v5335_v56  ;;  %v1656_v4 = vmul.f32 1.442695, %v1530_v46 }
 0x298   : > { %3998 = vmatprep.subr.bf16.mxu0 %v3997_v41  ;;  %v1730_v33 = vadd.f32 %v4421_v13, %v1729_v1  ;;  %4438 = vpow2.f32 %v1654_v5 }
 0x299   : > { %v4423_v38 = vpop.eup %4422  ;;  %4000 = vmatpush3.bf16.msra.mxu0 %v3997_v41  ;;  %4440 = vpow2.f32 %v1624_v2  ;;  %v1658_v21 = vmul.f32 1.442695, %v1531_v3 }
 0x29a   : > { %v4425_v31 = vpop.eup %4424  ;;  %v1731_v30 = vadd.f32 %v4423_v38, %v1730_v33  ;;  %v4029_v29 = vpack.c.bf16 %v4423_v38, %v4421_v13  ;;  %4442 = vpow2.f32 %v1626_v42 }
 0x29b   : > { %v4427_v44 = vpop.eup %4426  ;;  %v1711_v18 = vadd.f32 %v4425_v31, %v1710_v49  ;;  %4444 = vpow2.f32 %v1656_v4 }
 0x29c   : > { %v4429_v0 = vpop.eup %4428  ;;  %4030 = vmatprep.subr.bf16.mxu1 %v4029_v29  ;;  %v4001_v62 = vpack.c.bf16 %v4427_v44, %v4425_v31  ;;  %4446 = vpow2.f32 %v1658_v21 }
 0x29d   : > { %v4431_v39 = vpop.eup %4430  ;;  %4032 = vmatpush3.bf16.msra.mxu1 %v4029_v29  ;;  %v1712_v60 = vadd.f32 %v4427_v44, %v1711_v18  ;;  %v1732_v28 = vadd.f32 %v4429_v0, %v1731_v30  ;;  %v6002_v44 = vld [vmem:[#allocation39_spill] sm:$0xff] }
 0x29e   : > { %4002 = vmatprep.subr.bf16.mxu0 %v4001_v62  ;;  %v4033_v50 = vpack.c.bf16 %v4431_v39, %v4429_v0  ;;  %v4433_v19 = vpop.eup %4432 }
 0x29f   : > { %v1733_v1 = vadd.f32 %v4431_v39, %v1732_v28  ;;  %4004 = vmatpush3.bf16.msra.mxu0 %v4001_v62  ;;  %v4435_v61 = vpop.eup %4434  ;;  %v1713_v63 = vadd.f32 %v4433_v19, %v1712_v60  ;;  %v6003_v62 = vld [vmem:[#allocation40_spill] sm:$0xff]  ;;  %v6004_v39 = vld [vmem:[#allocation43_spill] sm:$0xff] }
 0x2a0   : > { %4034 = vmatprep.subr.bf16.mxu1 %v4033_v50  ;;  %v4437_v20 = vpop.eup %4436  ;;  %v4005_v10 = vpack.c.bf16 %v4435_v61, %v4433_v19  ;;  %v6006_v19 = vld [vmem:[#allocation41_spill] sm:$0xff] }
 0x2a1   : > { %4036 = vmatpush3.bf16.msra.mxu1 %v4033_v50  ;;  %v1714_v14 = vadd.f32 %v4435_v61, %v1713_v63  ;;  %v1734_v23 = vadd.f32 %v4437_v20, %v1733_v1  ;;  %v6005_v50 = vld [vmem:[#allocation44_spill] sm:$0xff]  ;;  %v6007_v63 = vld [vmem:[#allocation45_spill] sm:$0xff] }
 0x2a2   : > { %v4439_v32 = vpop.eup %4438  ;;  %4006 = vmatprep.subr.bf16.mxu0 %v4005_v10 }
 0x2a3   : > { %v4441_v46 = vpop.eup %4440  ;;  %v4037_v49 = vpack.c.bf16 %v4439_v32, %v4437_v20  ;;  %v1735_v5 = vadd.f32 %v4439_v32, %v1734_v23  ;;  %4008 = vmatpush3.bf16.msra.mxu0 %v4005_v10 }
 0x2a4   : > { %v4443_v41 = vpop.eup %4442  ;;  %v1715_v13 = vadd.f32 %v4441_v46, %v1714_v14 }
 0x2a5   : > { %v4445_v2 = vpop.eup %4444  ;;  %4038 = vmatprep.subr.bf16.mxu1 %v4037_v49  ;;  %v4009_v42 = vpack.c.bf16 %v4443_v41, %v4441_v46 }
 0x2a6   : > { %v4447_v3 = vpop.eup %4446  ;;  %4040 = vmatpush3.bf16.msra.mxu1 %v4037_v49  ;;  %v1716_v33 = vadd.f32 %v4443_v41, %v1715_v13  ;;  %v1736_v4 = vadd.f32 %v4445_v2, %v1735_v5 }
 0x2a7   : > { %4010 = vmatprep.subr.bf16.mxu0 %v4009_v42  ;;  %v4041_v38 = vpack.c.bf16 %v4447_v3, %v4445_v2 }
 0x2a8   : > { %v1717_v21 = vrot.slane %v1716_v33, 4  ;;  %v1737_v31 = vadd.f32 %v4447_v3, %v1736_v4  ;;  %4012 = vmatpush3.bf16.msra.mxu0 %v4009_v42 }
 0x2a9   : > { %4042 = vmatprep.subr.bf16.mxu1 %v4041_v38 }
 0x2aa   : > { %v1718_v30 = vadd.f32 %v1717_v21, %v1716_v33  ;;  %v1738_v29 = vrot.slane %v1737_v31, 4  ;;  %4044 = vmatpush3.bf16.msra.mxu1 %v4041_v38 }
 0x2ab   : > { %3690 = vmatmul.mubr.f32.vlgmr.msra.gmra.mrb[4].mxu0 %v6002_v44 }
 0x2ac   : > { %v1719_v18 = vrot.slane %v1718_v30, 2  ;;  %v1739_v0 = vadd.f32 %v1738_v29, %v1737_v31  ;;  %3692 = vmatprep.mubr.f32.mxu0 %v6003_v62 }
 0x2ad   : > { %3728 = vmatmul.mubr.f32.vlgmr.msra.gmra.mrb[4].mxu1 %v6004_v39 }
 0x2ae   : > { %v1720_v60 = vadd.f32 %v1719_v18, %v1718_v30  ;;  %v1740_v28 = vrot.slane %v1739_v0, 2  ;;  %3730 = vmatprep.mubr.f32.mxu1 %v6005_v50 }
 0x2af   : > { %3693 = vmatmul.mubr.f32.gmra.mrb[6].mxu0 %v6006_v19 }
 0x2b0   : > { %v1721_v1 = vrot.slane %v1720_v60, 1  ;;  %v1741_v61 = vadd.f32 %v1740_v28, %v1739_v0 }
 0x2b1   : > { %3731 = vmatmul.mubr.f32.gmra.mrb[6].mxu1 %v6007_v63 }
 0x2b2   : > { %v1722_v20 = vadd.f32 %v1721_v1, %v1720_v60  ;;  %v1742_v10 = vrot.slane %v1741_v61, 1 }
 0x2b4   : > { %1746 = vst [vmem:[#allocation3 + $0x2] sm:$0x1] %v1722_v20  ;;  %v1743_v32 = vadd.f32 %v1742_v10, %v1741_v61 }
 0x2b6   : > { %1747 = vst [vmem:[#allocation3 + $0x3] sm:$0x1] %v1743_v32 }
 0x35a   : > { %v3615_v14 = vpop.f32.mrb[0].mxu0 }
 0x35b   : > { %2089 = vst [vmem:[#allocation4 + $0x8] sm:$0xff] %v3615_v14  ;;  %v1814_v23 = vpop.f32.mrb[1].mxu0 }
 0x35c   : > { %v3653_v46 = vpop.f32.mrb[0].mxu1  ;;  %2088 = vst [vmem:[#allocation4] sm:$0xff] %v1814_v23 }
 0x35d   : > { %2093 = vst [vmem:[#allocation4 + $0x28] sm:$0xff] %v3653_v46  ;;  %v1899_v49 = vpop.f32.mrb[1].mxu1 }
 0x35e   : > { %2092 = vst [vmem:[#allocation4 + $0x20] sm:$0xff] %v1899_v49  ;;  %v3618_v41 = vpop.f32.mrb[2].mxu0 }
 0x35f   : > { %2091 = vst [vmem:[#allocation4 + $0x18] sm:$0xff] %v3618_v41  ;;  %v1824_v5 = vpop.f32.mrb[3].mxu0 }
 0x360   : > { %v3656_v13 = vpop.f32.mrb[2].mxu1  ;;  %2090 = vst [vmem:[#allocation4 + $0x10] sm:$0xff] %v1824_v5 }
 0x361   : > { %2095 = vst [vmem:[#allocation4 + $0x38] sm:$0xff] %v3656_v13  ;;  %v1909_v2 = vpop.f32.mrb[3].mxu1 }
 0x362   : > { %2094 = vst [vmem:[#allocation4 + $0x30] sm:$0xff] %v1909_v2 }
 0x37e   : > { %v3691_v42 = vpop.f32.mrb[4].mxu0 }
 0x37f   : > { %2097 = vst [vmem:[#allocation4 + $0x48] sm:$0xff] %v3691_v42  ;;  %v1984_v3 = vpop.f32.mrb[5].mxu0 }
 0x380   : > { %v3729_v33 = vpop.f32.mrb[4].mxu1  ;;  %2096 = vst [vmem:[#allocation4 + $0x40] sm:$0xff] %v1984_v3 }
 0x381   : > { %2101 = vst [vmem:[#allocation4 + $0x68] sm:$0xff] %v3729_v33  ;;  %v2069_v4 = vpop.f32.mrb[5].mxu1 }
 0x382   : > { %2100 = vst [vmem:[#allocation4 + $0x60] sm:$0xff] %v2069_v4  ;;  %v3694_v38 = vpop.f32.mrb[6].mxu0 }
 0x383   : > { %2099 = vst [vmem:[#allocation4 + $0x58] sm:$0xff] %v3694_v38  ;;  %v1994_v21 = vpop.f32.mrb[7].mxu0 }
 0x384   : > { %v3732_v31 = vpop.f32.mrb[6].mxu1  ;;  %2098 = vst [vmem:[#allocation4 + $0x50] sm:$0xff] %v1994_v21 }
 0x385   : > { %2103 = vst [vmem:[#allocation4 + $0x78] sm:$0xff] %v3732_v31  ;;  %v2079_v30 = vpop.f32.mrb[7].mxu1 }
 0x386   : > { %2102 = vst [vmem:[#allocation4 + $0x70] sm:$0xff] %v2079_v30 }
 0x387 PF: > { %p3207_p9 = scmp.le.s32.totalorder %s4702_s18, 0 }
 0x388   : > { %v5536_v29 = vld [vmem:[#allocation2] sm:$0x1] (!%p3207_p9)  ;;  %v2136_v44 = vlaneseq (!%p3207_p9)  ;;  %v5538_v18 = vld [vmem:[#allocation2 + $0x1] sm:$0x1] (!%p3207_p9)  ;;  %3765 = vmatprep.mubr.f32.mxu0 (!%p3207_p9), %v5016_v40  ;;  %3803 = vmatprep.mubr.f32.mxu1 (!%p3207_p9), %v5028_v45  ;;  %v5542_v0 = vld [vmem:[#allocation2 + $0x2] sm:$0x1] (!%p3207_p9) }
 0x389   : > { %2111 = sbr.rel (%p3207_p9) target bundleno = 1219 (0x4c3), region = 56  ;;  %v5546_v62 = vmax.f32 (!%p3207_p9), %v5536_v29, %v5245_v26  ;;  %v5550_v39 = vmax.f32 (!%p3207_p9), %v5538_v18, %v5247_v27  ;;  %v5554_v60 = vmax.f32 (!%p3207_p9), %v5542_v0, %v5333_v54  ;;  %v6008_v63 = vld [vmem:[#allocation48_spill] sm:$0xff] (!%p3207_p9)  ;;  %v6009_v10 = vld [vmem:[#allocation46_spill] sm:$0xff] (!%p3207_p9)  ;;  %v6010_v14 = vld [vmem:[#allocation49_spill] sm:$0xff] (!%p3207_p9) }
 0x38a   : > { %v2137_v50 = vshrl.u32 (!%p3207_p9), %v2136_v44, 7  ;;  %v6012_v31 = vld [vmem:[#allocation50_spill] sm:$0xff] (!%p3207_p9) }
 0x38b   : > { %2876 = vst [vmem:[#allocation2] sm:$0x1] (!%p3207_p9), %v5546_v62  ;;  %2877 = vst [vmem:[#allocation2 + $0x1] sm:$0x1] (!%p3207_p9), %v5550_v39 }
 0x38c   : > { %2878 = vst [vmem:[#allocation2 + $0x2] sm:$0x1] (!%p3207_p9), %v5554_v60  ;;  %v5565_v45 = vsub.s32 (!%p3207_p9), 0, %v2137_v50 }
 0x38e   : > { %v5556_v28 = vld [vmem:[#allocation2 + $0x3] sm:$0x1] (!%p3207_p9)  ;;  %v5570_v54 = vrot.slane (!%p3207_p9), %v5546_v62, %v5565_v45  ;;  %v5574_v26 = vrot.slane (!%p3207_p9), %v5550_v39, %v5565_v45  ;;  %v5600_v13 = vrot.slane (!%p3207_p9), %v5554_v60, %v5565_v45 }
 0x38f   : > { %v5560_v40 = vmax.f32 (!%p3207_p9), %v5556_v28, %v5335_v56  ;;  %v2120_v56 = vsub.f32 (!%p3207_p9), %v5536_v29, %v5546_v62  ;;  %v6040_v62 = vld [vmem:[#allocation35_spill] sm:$0xff] (!%p3207_p9) }
 0x390   : > { %v2156_v27 = vsub.f32 %v5141_v48, %v5570_v54  ;;  %v2157_v19 = vsub.f32 %v5137_v43, %v5570_v54  ;;  %v2172_v1 = vsub.f32 %v5143_v59, %v5574_v26  ;;  %v2173_v61 = vsub.f32 %v5139_v47, %v5574_v26  ;;  %v6011_v48 = vld [vmem:[#allocation47_spill] sm:$0xff] }
 0x391   : > { %2879 = vst [vmem:[#allocation2 + $0x3] sm:$0x1] %v5560_v40  ;;  %v2158_v20 = vsub.f32 %v6008_v63, %v5570_v54  ;;  %v2159_v32 = vsub.f32 %v6009_v10, %v5570_v54  ;;  %v2174_v23 = vsub.f32 %v6010_v14, %v5574_v26  ;;  %v2175_v46 = vsub.f32 %v6011_v48, %v5574_v26 }
 0x392   : > { %v2220_v49 = vmul.f32 1.442695, %v2156_v27  ;;  %v2222_v43 = vmul.f32 1.442695, %v2157_v19  ;;  %v2252_v41 = vmul.f32 1.442695, %v2172_v1  ;;  %v2160_v59 = vsub.f32 %v5165_v8, %v5570_v54 }
 0x393   : > { %v2254_v5 = vmul.f32 1.442695, %v2173_v61  ;;  %v2161_v47 = vsub.f32 %v5161_v6, %v5570_v54  ;;  %v5604_v2 = vrot.slane %v5560_v40, %v5565_v45  ;;  %v2224_v42 = vmul.f32 1.442695, %v2158_v20 }
 0x394   : > { %4448 = vpow2.f32 %v2220_v49  ;;  %v2226_v3 = vmul.f32 1.442695, %v2159_v32  ;;  %v2256_v33 = vmul.f32 1.442695, %v2174_v23  ;;  %v2258_v4 = vmul.f32 1.442695, %v2175_v46 }
 0x395   : > { %4450 = vpow2.f32 %v2222_v43  ;;  %v2176_v8 = vsub.f32 %v5167_v9, %v5574_v26  ;;  %v2177_v6 = vsub.f32 %v5163_v7, %v5574_v26  ;;  %v2228_v38 = vmul.f32 1.442695, %v2160_v59  ;;  %v6015_v23 = vld [vmem:[#allocation52_spill] sm:$0xff] }
 0x396   : > { %4452 = vpow2.f32 %v2252_v41  ;;  %v2162_v21 = vsub.f32 %v5177_v16, %v5570_v54  ;;  %v2163_v30 = vsub.f32 %v6012_v31, %v5570_v54  ;;  %v2230_v44 = vmul.f32 1.442695, %v2161_v47  ;;  %v6017_v41 = vld [vmem:[#allocation53_spill] sm:$0xff] }
 0x397   : > { %4454 = vpow2.f32 %v2254_v5  ;;  %v2178_v50 = vsub.f32 %v5179_v17, %v5574_v26  ;;  %v2179_v27 = vsub.f32 %v5175_v15, %v5574_v26  ;;  %v2260_v9 = vmul.f32 1.442695, %v2176_v8  ;;  %v6013_v17 = vld [vmem:[#allocation51_spill] sm:$0xff]  ;;  %v6014_v15 = vld [vmem:[#allocation54_spill] sm:$0xff] }
 0x398   : > { %4456 = vpow2.f32 %v2224_v42  ;;  %v2262_v19 = vmul.f32 1.442695, %v2177_v6  ;;  %v2232_v7 = vmul.f32 1.442695, %v2162_v21  ;;  %v2234_v1 = vmul.f32 1.442695, %v2163_v30 }
 0x399   : > { %4458 = vpow2.f32 %v2226_v3  ;;  %v2164_v16 = vsub.f32 %v5189_v24, %v5570_v54  ;;  %v2165_v61 = vsub.f32 %v5185_v22, %v5570_v54  ;;  %v2180_v63 = vsub.f32 %v5191_v25, %v5574_v26  ;;  %v6016_v25 = vld [vmem:[#allocation55_spill] sm:$0xff]  ;;  %v6018_v42 = vld [vmem:[#allocation58_spill] sm:$0xff] }
 0x39a   : > { %4460 = vpow2.f32 %v2256_v33  ;;  %v2181_v20 = vsub.f32 %v6013_v17, %v5574_v26  ;;  %v2166_v10 = vsub.f32 %v6014_v15, %v5570_v54  ;;  %v2264_v32 = vmul.f32 1.442695, %v2178_v50  ;;  %v6019_v33 = vld [vmem:[#allocation56_spill] sm:$0xff]  ;;  %v6020_v21 = vld [vmem:[#allocation59_spill] sm:$0xff] }
 0x39b   : > { %4462 = vpow2.f32 %v2258_v4  ;;  %v2266_v14 = vmul.f32 1.442695, %v2179_v27  ;;  %v2167_v48 = vsub.f32 %v6015_v23, %v5570_v54  ;;  %v2236_v24 = vmul.f32 1.442695, %v2164_v16  ;;  %v6021_v27 = vld [vmem:[#allocation57_spill] sm:$0xff] }
 0x39c   : > { %4464 = vpow2.f32 %v2228_v38  ;;  %v2238_v46 = vmul.f32 1.442695, %v2165_v61  ;;  %v2268_v22 = vmul.f32 1.442695, %v2180_v63  ;;  %v2270_v49 = vmul.f32 1.442695, %v2181_v20 }
 0x39d   : > { %4466 = vpow2.f32 %v2230_v44  ;;  %v2182_v43 = vsub.f32 %v6016_v25, %v5574_v26  ;;  %v2183_v59 = vsub.f32 %v6017_v41, %v5574_v26  ;;  %v2240_v47 = vmul.f32 1.442695, %v2166_v10 }
 0x39e   : > { %v4449_v5 = vpop.eup %4448  ;;  %4468 = vpow2.f32 %v2260_v9  ;;  %v2168_v3 = vsub.f32 %v6018_v42, %v5570_v54  ;;  %v2169_v4 = vsub.f32 %v6019_v33, %v5570_v54  ;;  %v2242_v6 = vmul.f32 1.442695, %v2167_v48 }
 0x39f   : > { %v4451_v8 = vpop.eup %4450  ;;  %4470 = vpow2.f32 %v2262_v19  ;;  %v5638_v38 = vmul.f32 1.442695, %v2182_v43  ;;  %v2184_v31 = vsub.f32 %v6020_v21, %v5574_v26  ;;  %v2185_v9 = vsub.f32 %v6021_v27, %v5574_v26 }
 0x3a0   : > { %v4453_v30 = vpop.eup %4452  ;;  %v2356_v44 = vadd.f32 %v4451_v8, %v4449_v5  ;;  %v4045_v50 = vpack.c.bf16 %v4451_v8, %v4449_v5  ;;  %4472 = vpow2.f32 %v2232_v7  ;;  %v2274_v61 = vmul.f32 1.442695, %v2183_v59 }
 0x3a1   : > { %v4455_v16 = vpop.eup %4454  ;;  %4474 = vpow2.f32 %v2234_v1  ;;  %v5644_v63 = vmul.f32 1.442695, %v2168_v3  ;;  %v5646_v17 = vmul.f32 1.442695, %v2169_v4  ;;  %v2170_v10 = vsub.f32 %v5225_v12, %v5570_v54  ;;  %v6022_v1 = vld [vmem:[#allocation60_spill] sm:$0xff] }
 0x3a2   : > { %v4457_v19 = vpop.eup %4456  ;;  %4046 = vmatprep.subr.bf16.mxu0 %v4045_v50  ;;  %v2377_v20 = vadd.f32 %v4455_v16, %v4453_v30  ;;  %v4077_v15 = vpack.c.bf16 %v4455_v16, %v4453_v30  ;;  %4476 = vpow2.f32 %v2264_v32  ;;  %v5650_v48 = vmul.f32 1.442695, %v2184_v31  ;;  %v6023_v32 = vld [vmem:[#allocation61_spill] sm:$0xff] }
 0x3a3   : > { %v4459_v23 = vpop.eup %4458  ;;  %4048 = vmatpush3.bf16.msra.mxu0 %v4045_v50  ;;  %v2357_v7 = vadd.f32 %v4457_v19, %v2356_v44  ;;  %4478 = vpow2.f32 %v2266_v14  ;;  %v2171_v25 = vsub.f32 %v6022_v1, %v5570_v54  ;;  %v5654_v59 = vmul.f32 1.442695, %v2185_v9 }
 0x3a4   : > { %v4461_v43 = vpop.eup %4460  ;;  %4078 = vmatprep.subr.bf16.mxu1 %v4077_v15  ;;  %v4049_v41 = vpack.c.bf16 %v4459_v23, %v4457_v19  ;;  %4480 = vpow2.f32 %v2236_v24  ;;  %v2186_v5 = vsub.f32 %v6023_v32, %v5574_v26  ;;  %v2187_v14 = vsub.f32 %v5223_v11, %v5574_v26 }
 0x3a5   : > { %v4463_v42 = vpop.eup %4462  ;;  %4080 = vmatpush3.bf16.msra.mxu1 %v4077_v15  ;;  %v2358_v12 = vadd.f32 %v4459_v23, %v2357_v7  ;;  %v2378_v3 = vadd.f32 %v4461_v43, %v2377_v20  ;;  %4482 = vpow2.f32 %v2238_v46  ;;  %v2248_v4 = vmul.f32 1.442695, %v2170_v10 }
 0x3a6   : > { %v4465_v33 = vpop.eup %4464  ;;  %4050 = vmatprep.subr.bf16.mxu0 %v4049_v41  ;;  %v4081_v54 = vpack.c.bf16 %v4463_v42, %v4461_v43  ;;  %4484 = vpow2.f32 %v2268_v22  ;;  %v5660_v8 = vmul.f32 1.442695, %v2171_v25  ;;  %v2188_v30 = vsub.f32 %v5237_v36, %v5600_v13 }
 0x3a7   : > { %v4467_v24 = vpop.eup %4466  ;;  %v2379_v21 = vadd.f32 %v4463_v42, %v2378_v3  ;;  %4052 = vmatpush3.bf16.msra.mxu0 %v4049_v41  ;;  %v2359_v31 = vadd.f32 %v4465_v33, %v2358_v12  ;;  %4486 = vpow2.f32 %v2270_v49  ;;  %v2280_v11 = vmul.f32 1.442695, %v2186_v5  ;;  %v6024_v5 = vld [vmem:[#allocation63_spill] sm:$0xff]  ;;  %v6025_v3 = vld [vmem:[#allocation62_spill] sm:$0xff] }
 0x3a8   : > { %v4469_v44 = vpop.eup %4468  ;;  %4082 = vmatprep.subr.bf16.mxu1 %v4081_v54  ;;  %v4053_v46 = vpack.c.bf16 %v4467_v24, %v4465_v33  ;;  %4488 = vpow2.f32 %v2240_v47  ;;  %v2189_v26 = vsub.f32 %v5233_v34, %v5600_v13  ;;  %v2282_v9 = vmul.f32 1.442695, %v2187_v14 }
 0x3a9   : > { %v4471_v22 = vpop.eup %4470  ;;  %4084 = vmatpush3.bf16.msra.mxu1 %v4081_v54  ;;  %v2360_v50 = vadd.f32 %v4467_v24, %v2359_v31  ;;  %v2380_v27 = vadd.f32 %v4469_v44, %v2379_v21  ;;  %4490 = vpow2.f32 %v2242_v6  ;;  %v2204_v36 = vsub.f32 %v5239_v37, %v5604_v2  ;;  %v6026_v31 = vld [vmem:[#allocation66_spill] sm:$0xff] }
 0x3aa   : > { %v4473_v16 = vpop.eup %4472  ;;  %4054 = vmatprep.subr.bf16.mxu0 %v4053_v46  ;;  %v4085_v49 = vpack.c.bf16 %v4471_v22, %v4469_v44  ;;  %4492 = vpow2.f32 %v5638_v38  ;;  %v2205_v47 = vsub.f32 %v5235_v35, %v5604_v2  ;;  %v2284_v15 = vmul.f32 1.442695, %v2188_v30 }
 0x3ab   : > { %v4475_v19 = vpop.eup %4474  ;;  %v2381_v20 = vadd.f32 %v4471_v22, %v2380_v27  ;;  %4056 = vmatpush3.bf16.msra.mxu0 %v4053_v46  ;;  %v2361_v34 = vadd.f32 %v4473_v16, %v2360_v50  ;;  %4494 = vpow2.f32 %v2274_v61  ;;  %v2286_v23 = vmul.f32 1.442695, %v2189_v26 }
 0x3ac   : > { %v4477_v10 = vpop.eup %4476  ;;  %4086 = vmatprep.subr.bf16.mxu1 %v4085_v49  ;;  %v4057_v6 = vpack.c.bf16 %v4475_v19, %v4473_v16  ;;  %4496 = vpow2.f32 %v5644_v63  ;;  %v2190_v38 = vsub.f32 %v5253_v57, %v5600_v13  ;;  %v2191_v35 = vsub.f32 %v5249_v58, %v5600_v13 }
 0x3ad   : > { %v4479_v7 = vpop.eup %4478  ;;  %4088 = vmatpush3.bf16.msra.mxu1 %v4085_v49  ;;  %v2362_v37 = vadd.f32 %v4475_v19, %v2361_v34  ;;  %v2382_v1 = vadd.f32 %v4477_v10, %v2381_v20  ;;  %4498 = vpow2.f32 %v5646_v17  ;;  %v2316_v43 = vmul.f32 1.442695, %v2204_v36  ;;  %v6028_v49 = vld [vmem:[#allocation67_spill] sm:$0xff]  ;;  %v6029_v20 = vld [vmem:[#allocation65_spill] sm:$0xff] }
 0x3ae   : > { %v4481_v61 = vpop.eup %4480  ;;  %4058 = vmatprep.subr.bf16.mxu0 %v4057_v6  ;;  %v4089_v25 = vpack.c.bf16 %v4479_v7, %v4477_v10  ;;  %4500 = vpow2.f32 %v5650_v48  ;;  %v2318_v63 = vmul.f32 1.442695, %v2205_v47  ;;  %v2206_v42 = vsub.f32 %v6024_v5, %v5604_v2 }
 0x3af   : > { %v4483_v41 = vpop.eup %4482  ;;  %v2383_v32 = vadd.f32 %v4479_v7, %v2382_v1  ;;  %4060 = vmatpush3.bf16.msra.mxu0 %v4057_v6  ;;  %v2363_v57 = vadd.f32 %v4481_v61, %v2362_v37  ;;  %4502 = vpow2.f32 %v5654_v59  ;;  %v2288_v58 = vmul.f32 1.442695, %v2190_v38  ;;  %v6030_v1 = vld [vmem:[#allocation70_spill] sm:$0xff] }
 0x3b0   : > { %v4485_v17 = vpop.eup %4484  ;;  %4090 = vmatprep.subr.bf16.mxu1 %v4089_v25  ;;  %v4061_v12 = vpack.c.bf16 %v4483_v41, %v4481_v61  ;;  %4504 = vpow2.f32 %v2248_v4  ;;  %v2207_v14 = vsub.f32 %v6025_v3, %v5604_v2  ;;  %v2290_v24 = vmul.f32 1.442695, %v2191_v35  ;;  %v6027_v4 = vld [vmem:[#allocation64_spill] sm:$0xff] }
 0x3b1   : > { %v4487_v48 = vpop.eup %4486  ;;  %4092 = vmatpush3.bf16.msra.mxu1 %v4089_v25  ;;  %v2364_v33 = vadd.f32 %v4483_v41, %v2363_v57  ;;  %v2384_v54 = vadd.f32 %v4485_v17, %v2383_v32  ;;  %4506 = vpow2.f32 %v5660_v8  ;;  %v2192_v30 = vsub.f32 %v6026_v31, %v5600_v13  ;;  %v6031_v41 = vld [vmem:[#allocation68_spill] sm:$0xff] }
 0x3b2   : > { %v4489_v21 = vpop.eup %4488  ;;  %4062 = vmatprep.subr.bf16.mxu0 %v4061_v12  ;;  %v4093_v59 = vpack.c.bf16 %v4487_v48, %v4485_v17  ;;  %4508 = vpow2.f32 %v2280_v11  ;;  %v2193_v44 = vsub.f32 %v6027_v4, %v5600_v13  ;;  %v2320_v50 = vmul.f32 1.442695, %v2206_v42 }
 0x3b3   : > { %v4491_v46 = vpop.eup %4490  ;;  %v2385_v26 = vadd.f32 %v4487_v48, %v2384_v54  ;;  %4064 = vmatpush3.bf16.msra.mxu0 %v4061_v12  ;;  %v2365_v22 = vadd.f32 %v4489_v21, %v2364_v33  ;;  %4510 = vpow2.f32 %v2282_v9  ;;  %v2322_v16 = vmul.f32 1.442695, %v2207_v14  ;;  %v6032_v12 = vld [vmem:[#allocation71_spill] sm:$0xff]  ;;  %v6033_v14 = vld [vmem:[#allocation69_spill] sm:$0xff] }
 0x3b4   : > { %v4493_v27 = vpop.eup %4492  ;;  %4094 = vmatprep.subr.bf16.mxu1 %v4093_v59  ;;  %v4065_v8 = vpack.c.bf16 %v4491_v46, %v4489_v21  ;;  %4512 = vpow2.f32 %v2284_v15  ;;  %v2208_v11 = vsub.f32 %v6028_v49, %v5604_v2  ;;  %v2209_v34 = vsub.f32 %v6029_v20, %v5604_v2 }
 0x3b5   : > { %v4495_v36 = vpop.eup %4494  ;;  %4096 = vmatpush3.bf16.msra.mxu1 %v4093_v59  ;;  %v2366_v47 = vadd.f32 %v4491_v46, %v2365_v22  ;;  %v2386_v19 = vadd.f32 %v4493_v27, %v2385_v26  ;;  %4514 = vpow2.f32 %v2286_v23  ;;  %v2292_v6 = vmul.f32 1.442695, %v2192_v30  ;;  %v6034_v30 = vld [vmem:[#allocation74_spill] sm:$0xff]  ;;  %v6035_v22 = vld [vmem:[#allocation72_spill] sm:$0xff] }
 0x3b6   : > { %v4497_v10 = vpop.eup %4496  ;;  %4066 = vmatprep.subr.bf16.mxu0 %v4065_v8  ;;  %v4097_v9 = vpack.c.bf16 %v4495_v36, %v4493_v27  ;;  %4516 = vpow2.f32 %v2316_v43  ;;  %v2294_v38 = vmul.f32 1.442695, %v2193_v44  ;;  %v2194_v35 = vsub.f32 %v6030_v1, %v5600_v13 }
 0x3b7   : > { %v4499_v7 = vpop.eup %4498  ;;  %v2387_v15 = vadd.f32 %v4495_v36, %v2386_v19  ;;  %4068 = vmatpush3.bf16.msra.mxu0 %v4065_v8  ;;  %v2367_v37 = vadd.f32 %v4497_v10, %v2366_v47  ;;  %4518 = vpow2.f32 %v2318_v63  ;;  %v2324_v25 = vmul.f32 1.442695, %v2208_v11  ;;  %v6036_v19 = vld [vmem:[#allocation75_spill] sm:$0xff] }
 0x3b8   : > { %v4501_v61 = vpop.eup %4500  ;;  %4098 = vmatprep.subr.bf16.mxu1 %v4097_v9  ;;  %v4069_v23 = vpack.c.bf16 %v4499_v7, %v4497_v10  ;;  %4520 = vpow2.f32 %v2288_v58  ;;  %v2195_v32 = vsub.f32 %v6031_v41, %v5600_v13  ;;  %v2326_v42 = vmul.f32 1.442695, %v2209_v34 }
 0x3b9   : > { %v4503_v57 = vpop.eup %4502  ;;  %4100 = vmatpush3.bf16.msra.mxu1 %v4097_v9  ;;  %v2368_v43 = vadd.f32 %v4499_v7, %v2367_v37  ;;  %v2388_v5 = vadd.f32 %v4501_v61, %v2387_v15  ;;  %4522 = vpow2.f32 %v2290_v24  ;;  %v2210_v3 = vsub.f32 %v6032_v12, %v5604_v2  ;;  %v6042_v12 = vld [vmem:[#allocation76_spill] sm:$0xff] }
 0x3ba   : > { %v4505_v17 = vpop.eup %4504  ;;  %4070 = vmatprep.subr.bf16.mxu0 %v4069_v23  ;;  %v4101_v63 = vpack.c.bf16 %v4503_v57, %v4501_v61  ;;  %4524 = vpow2.f32 %v2320_v50  ;;  %v2211_v58 = vsub.f32 %v6033_v14, %v5604_v2  ;;  %v2296_v21 = vmul.f32 1.442695, %v2194_v35  ;;  %v6037_v35 = vld [vmem:[#allocation32_spill] sm:$0xff] }
 0x3bb   : > { %v4507_v48 = vpop.eup %4506  ;;  %v2389_v33 = vadd.f32 %v4503_v57, %v2388_v5  ;;  %4072 = vmatpush3.bf16.msra.mxu0 %v4069_v23  ;;  %v2369_v54 = vadd.f32 %v4505_v17, %v2368_v43  ;;  %4526 = vpow2.f32 %v2322_v16  ;;  %v2298_v31 = vmul.f32 1.442695, %v2195_v32 }
 0x3bc   : > { %v4509_v59 = vpop.eup %4508  ;;  %4102 = vmatprep.subr.bf16.mxu1 %v4101_v63  ;;  %v4073_v24 = vpack.c.bf16 %v4507_v48, %v4505_v17  ;;  %4528 = vpow2.f32 %v2292_v6  ;;  %v2196_v4 = vsub.f32 %v6034_v30, %v5600_v13  ;;  %v2197_v50 = vsub.f32 %v6035_v22, %v5600_v13  ;;  %v6041_v17 = vld [vmem:[#allocation78_spill] sm:$0xff] }
 0x3bd   : > { %v4511_v44 = vpop.eup %4510  ;;  %4104 = vmatpush3.bf16.msra.mxu1 %v4101_v63  ;;  %v2370_v46 = vadd.f32 %v4507_v48, %v2369_v54  ;;  %v2390_v26 = vadd.f32 %v4509_v59, %v2389_v33  ;;  %4530 = vpow2.f32 %v2294_v38  ;;  %v2328_v16 = vmul.f32 1.442695, %v2210_v3  ;;  %v6043_v54 = vld [vmem:[#allocation36_spill] sm:$0xff]  ;;  %v6044_v30 = vld [vmem:[#allocation34_spill] sm:$0xff] }
 0x3be   : > { %v4513_v27 = vpop.eup %4512  ;;  %4074 = vmatprep.subr.bf16.mxu0 %v4073_v24  ;;  %v4105_v8 = vpack.c.bf16 %v4511_v44, %v4509_v59  ;;  %4532 = vpow2.f32 %v2324_v25  ;;  %v2330_v49 = vmul.f32 1.442695, %v2211_v58  ;;  %v2212_v20 = vsub.f32 %v6036_v19, %v5604_v2  ;;  %v6038_v25 = vld [vmem:[#allocation73_spill] sm:$0xff] }
 0x3bf   : > { %v4515_v11 = vpop.eup %4514  ;;  %v2371_v36 = vrot.slane %v2370_v46, 4  ;;  %v5704_v47 = vadd.f32 %v4511_v44, %v2390_v26  ;;  %4076 = vmatpush3.bf16.msra.mxu0 %v4073_v24  ;;  %4534 = vpow2.f32 %v2326_v42  ;;  %v2300_v6 = vmul.f32 1.442695, %v2196_v4  ;;  %v6039_v42 = vld [vmem:[#allocation33_spill] sm:$0xff] }
 0x3c0   : > { %v4517_v34 = vpop.eup %4516  ;;  %4106 = vmatprep.subr.bf16.mxu1 %v4105_v8  ;;  %v2398_v10 = vadd.f32 %v4515_v11, %v4513_v27  ;;  %v4109_v9 = vpack.c.bf16 %v4515_v11, %v4513_v27  ;;  %4536 = vpow2.f32 %v2296_v21  ;;  %v2302_v15 = vmul.f32 1.442695, %v2197_v50  ;;  %v6045_v50 = vld [vmem:[#allocation38_spill] sm:$0xff]  ;;  %v6047_v11 = vld [vmem:[#allocation77_spill] sm:$0xff] }
 0x3c1   : > { %v4519_v38 = vpop.eup %4518  ;;  %v2372_v7 = vadd.f32 %v2371_v36, %v2370_v46  ;;  %4108 = vmatpush3.bf16.msra.mxu1 %v4105_v8  ;;  %4538 = vpow2.f32 %v2298_v31  ;;  %v2124_v37 = vmul.f32 1.442695, %v2120_v56  ;;  %v2213_v41 = vsub.f32 %v6038_v25, %v5604_v2  ;;  %v6048_v19 = vld [vmem:[#allocation37_spill] sm:$0xff] }
 0x3c2   : > { %v4521_v1 = vpop.eup %4520  ;;  %3766 = vmatmul.mubr.f32.vlgmr.msra.gmra.mrb[0].mxu0 %v6037_v35  ;;  %4110 = vmatprep.subr.bf16.mxu0 %v4109_v9  ;;  %v2419_v61 = vadd.f32 %v4519_v38, %v4517_v34  ;;  %v4141_v23 = vpack.c.bf16 %v4519_v38, %v4517_v34  ;;  %4540 = vpow2.f32 %v2328_v16  ;;  %v2332_v5 = vmul.f32 1.442695, %v2212_v20  ;;  %v6046_v16 = vld [vmem:[#allocation79_spill] sm:$0xff] }
 0x3c3   : > { %v4523_v32 = vpop.eup %4522  ;;  %v2373_v57 = vrot.slane %v2372_v7, 2  ;;  %4112 = vmatpush3.bf16.msra.mxu0 %v4109_v9  ;;  %v2399_v43 = vadd.f32 %v4521_v1, %v2398_v10  ;;  %4542 = vpow2.f32 %v2330_v49  ;;  %3768 = vmatprep.mubr.f32.mxu0 %v6039_v42  ;;  %v2198_v63 = vsub.f32 %v6041_v17, %v5600_v13  ;;  %v6049_v9 = vld [vmem:[#allocation42_spill] sm:$0xff] }
 0x3c4   : > { %v4525_v29 = vpop.eup %4524  ;;  %3804 = vmatmul.mubr.f32.vlgmr.msra.gmra.mrb[0].mxu1 %v6040_v62  ;;  %4142 = vmatprep.subr.bf16.mxu1 %v4141_v23  ;;  %v4113_v56 = vpack.c.bf16 %v4523_v32, %v4521_v1  ;;  %4544 = vpow2.f32 %v2300_v6  ;;  %v2199_v3 = vsub.f32 %v6042_v12, %v5600_v13  ;;  %v2334_v24 = vmul.f32 1.442695, %v2213_v41  ;;  %v6050_v41 = vld [vmem:[#allocation82_spill] sm:$0xff]  ;;  %v6052_v62 = vld [vmem:[#allocation83_spill] sm:$0xff] }
 0x3c5   : > { %v4527_v14 = vpop.eup %4526  ;;  %v2374_v58 = vadd.f32 %v2373_v57, %v2372_v7  ;;  %4144 = vmatpush3.bf16.msra.mxu1 %v4141_v23  ;;  %v2400_v48 = vadd.f32 %v4523_v32, %v2399_v43  ;;  %v2420_v33 = vadd.f32 %v4525_v29, %v2419_v61  ;;  %3806 = vmatprep.mubr.f32.mxu1 %v6043_v54  ;;  %4546 = vpow2.f32 %v2124_v37  ;;  %v6051_v57 = vld [vmem:[#allocation80_spill] sm:$0xff] }
 0x3c6   : > { %v4529_v21 = vpop.eup %4528  ;;  %4114 = vmatprep.subr.bf16.mxu0 %v4113_v56  ;;  %v4145_v59 = vpack.c.bf16 %v4527_v14, %v4525_v29  ;;  %4548 = vpow2.f32 %v2302_v15  ;;  %v2304_v31 = vmul.f32 1.442695, %v2198_v63  ;;  %3769 = vmatmul.mubr.f32.gmra.mrb[2].mxu0 %v6044_v30  ;;  %v2306_v22 = vmul.f32 1.442695, %v2199_v3 }
 0x3c7   : > { %v4531_v4 = vpop.eup %4530  ;;  %v2375_v44 = vrot.slane %v2374_v58, 1  ;;  %v2421_v46 = vadd.f32 %v4527_v14, %v2420_v33  ;;  %4116 = vmatpush3.bf16.msra.mxu0 %v4113_v56  ;;  %v2401_v26 = vadd.f32 %v4529_v21, %v2400_v48  ;;  %3841 = vmatprep.mubr.f32.mxu0 %v6045_v50  ;;  %4550 = vpow2.f32 %v2332_v5  ;;  %v6053_v33 = vld [vmem:[#allocation81_spill] sm:$0xff] }
 0x3c8   : > { %v4533_v27 = vpop.eup %4532  ;;  %4146 = vmatprep.subr.bf16.mxu1 %v4145_v59  ;;  %v4117_v8 = vpack.c.bf16 %v4531_v4, %v4529_v21  ;;  %v2214_v49 = vsub.f32 %v6046_v16, %v5604_v2  ;;  %v2215_v36 = vsub.f32 %v6047_v11, %v5604_v2  ;;  %3807 = vmatmul.mubr.f32.gmra.mrb[2].mxu1 %v6048_v19  ;;  %4552 = vpow2.f32 %v2334_v24 }
 0x3c9   : > { %v4535_v20 = vpop.eup %4534  ;;  %4148 = vmatpush3.bf16.msra.mxu1 %v4145_v59  ;;  %v2402_v34 = vadd.f32 %v4531_v4, %v2401_v26  ;;  %v2422_v10 = vadd.f32 %v4533_v27, %v2421_v46  ;;  %3879 = vmatprep.mubr.f32.mxu1 %v6049_v9  ;;  %v2376_v1 = vadd.f32 %v2375_v44, %v2374_v58  ;;  %4554 = vpow2.f32 %v2304_v31  ;;  %v2348_v4 = vld [vmem:[#allocation3] sm:$0x1] }
 0x3ca   : > { %v4537_v6 = vpop.eup %4536  ;;  %4118 = vmatprep.subr.bf16.mxu0 %v4117_v8  ;;  %v4149_v38 = vpack.c.bf16 %v4535_v20, %v4533_v27  ;;  %v2336_v7 = vmul.f32 1.442695, %v2214_v49  ;;  %v2338_v15 = vmul.f32 1.442695, %v2215_v36  ;;  %4556 = vpow2.f32 %v2306_v22 }
 0x3cb   : > { %v4539_v37 = vpop.eup %4538  ;;  %v2423_v35 = vadd.f32 %v4535_v20, %v2422_v10  ;;  %4120 = vmatpush3.bf16.msra.mxu0 %v4117_v8  ;;  %v2403_v61 = vadd.f32 %v4537_v6, %v2402_v34  ;;  %v2200_v32 = vsub.f32 %v6050_v41, %v5600_v13  ;;  %v2201_v43 = vsub.f32 %v6051_v57, %v5600_v13 }
 0x3cc   : > { %v4541_v23 = vpop.eup %4540  ;;  %4150 = vmatprep.subr.bf16.mxu1 %v4149_v38  ;;  %v4121_v25 = vpack.c.bf16 %v4539_v37, %v4537_v6  ;;  %4558 = vpow2.f32 %v2336_v7  ;;  %v2216_v56 = vsub.f32 %v6052_v62, %v5604_v2  ;;  %v2217_v54 = vsub.f32 %v6053_v33, %v5604_v2  ;;  %v6056_v33 = vld [vmem:[#allocation43_spill] sm:$0xff] }
 0x3cd   : > { %v4543_v5 = vpop.eup %4542  ;;  %4152 = vmatpush3.bf16.msra.mxu1 %v4149_v38  ;;  %v2404_v42 = vadd.f32 %v4539_v37, %v2403_v61  ;;  %v2424_v29 = vadd.f32 %v4541_v23, %v2423_v35  ;;  %4560 = vpow2.f32 %v2338_v15  ;;  %v2308_v12 = vmul.f32 1.442695, %v2200_v32 }
 0x3ce   : > { %v4545_v17 = vpop.eup %4544  ;;  %4122 = vmatprep.subr.bf16.mxu0 %v4121_v25  ;;  %v4153_v63 = vpack.c.bf16 %v4543_v5, %v4541_v23  ;;  %v2310_v3 = vmul.f32 1.442695, %v2201_v43  ;;  %v2340_v21 = vmul.f32 1.442695, %v2216_v56  ;;  %v2202_v24 = vsub.f32 %v5325_v52, %v5600_v13 }
 0x3cf   : > { %v5735_v14 = vpop.eup %4546  ;;  %v2425_v58 = vadd.f32 %v4543_v5, %v2424_v29  ;;  %4124 = vmatpush3.bf16.msra.mxu0 %v4121_v25  ;;  %v2405_v48 = vadd.f32 %v4545_v17, %v2404_v42  ;;  %4562 = vpow2.f32 %v2308_v12  ;;  %v2203_v31 = vsub.f32 %v5321_v53, %v5600_v13 }
 0x3d0   : > { %v4549_v59 = vpop.eup %4548  ;;  %4154 = vmatprep.subr.bf16.mxu1 %v4153_v63  ;;  %v2218_v30 = vsub.f32 %v5327_v51, %v5604_v2  ;;  %4564 = vpow2.f32 %v2310_v3  ;;  %v2342_v26 = vmul.f32 1.442695, %v2217_v54  ;;  %v2312_v50 = vmul.f32 1.442695, %v2202_v24  ;;  %v6057_v54 = vld [vmem:[#allocation44_spill] sm:$0xff] }
 0x3d1   : > { %4156 = vmatpush3.bf16.msra.mxu1 %v4153_v63  ;;  %v2406_v44 = vadd.f32 %v4549_v59, %v2405_v48  ;;  %v4125_v46 = vpack.c.bf16 %v4549_v59, %v4545_v17  ;;  %v4551_v22 = vpop.eup %4550  ;;  %4566 = vpow2.f32 %v2340_v21  ;;  %v2314_v27 = vmul.f32 1.442695, %v2203_v31  ;;  %v6055_v48 = vld [vmem:[#allocation40_spill] sm:$0xff]  ;;  %v6058_v21 = vld [vmem:[#allocation41_spill] sm:$0xff] }
 0x3d2   : > { %v2219_v8 = vsub.f32 %v5323_v55, %v5604_v2  ;;  %v2426_v52 = vadd.f32 %v4551_v22, %v2425_v58  ;;  %4568 = vpow2.f32 %v2342_v26  ;;  %v2344_v53 = vmul.f32 1.442695, %v2218_v30  ;;  %v4553_v51 = vpop.eup %4552  ;;  %v6054_v58 = vld [vmem:[#allocation39_spill] sm:$0xff]  ;;  %v6059_v59 = vld [vmem:[#allocation45_spill] sm:$0xff] }
 0x3d3   : > { %4126 = vmatprep.subr.bf16.mxu0 %v4125_v46  ;;  %v2352_v13 = vmul.f32 %v5735_v14, %v2348_v4  ;;  %4570 = vpow2.f32 %v2312_v50  ;;  %v4555_v49 = vpop.eup %4554  ;;  %v4157_v36 = vpack.c.bf16 %v4553_v51, %v4551_v22  ;;  %v2392_v24 = vrot.slane %v5704_v47, 4 }
 0x3d4   : > { %4128 = vmatpush3.bf16.msra.mxu0 %v4125_v46  ;;  %v2346_v16 = vmul.f32 1.442695, %v2219_v8  ;;  %v2427_v11 = vadd.f32 %v4553_v51, %v2426_v52  ;;  %4572 = vpow2.f32 %v2314_v27  ;;  %v4557_v20 = vpop.eup %4556  ;;  %v2407_v34 = vadd.f32 %v4555_v49, %v2406_v44  ;;  %v2349_v8 = vld [vmem:[#allocation3 + $0x1] sm:$0x1] }
 0x3d5   : > { %v2440_v19 = vadd.f32 %v2376_v1, %v2352_v13  ;;  %4574 = vpow2.f32 %v2344_v53  ;;  %4158 = vmatprep.subr.bf16.mxu1 %v4157_v36  ;;  %v4129_v55 = vpack.c.bf16 %v4557_v20, %v4555_v49  ;;  %v2393_v31 = vadd.f32 %v2392_v24, %v5704_v47 }
 0x3d6   : > { %v4559_v10 = vpop.eup %4558  ;;  %4576 = vpow2.f32 %v2346_v16  ;;  %4160 = vmatpush3.bf16.msra.mxu1 %v4157_v36  ;;  %v2408_v9 = vadd.f32 %v4557_v20, %v2407_v34  ;;  %v2121_v30 = vsub.f32 %v5538_v18, %v5550_v39  ;;  %v2122_v51 = vsub.f32 %v5542_v0, %v5554_v60 }
 0x3d7   : > { %2444 = vst [vmem:[#allocation3] sm:$0x1] %v2440_v19  ;;  %v4561_v2 = vpop.eup %4560  ;;  %v2428_v6 = vadd.f32 %v4559_v10, %v2427_v11  ;;  %4130 = vmatprep.subr.bf16.mxu0 %v4129_v55  ;;  %v2394_v4 = vrot.slane %v2393_v31, 2  ;;  %v2123_v11 = vsub.f32 %v5556_v28, %v5560_v40  ;;  %v2350_v19 = vld [vmem:[#allocation3 + $0x2] sm:$0x1]  ;;  %v2811_v28 = vrot.slane %v5735_v14, %v5565_v45  ;;  %v2789_v40 = vld [vmem:[#allocation4 + $0x8] sm:$0xff] }
 0x3d8   : > { %v4161_v38 = vpack.c.bf16 %v4561_v2, %v4559_v10  ;;  %4132 = vmatpush3.bf16.msra.mxu0 %v4129_v55  ;;  %v2126_v44 = vmul.f32 1.442695, %v2121_v30  ;;  %v2128_v16 = vmul.f32 1.442695, %v2122_v51 }
 0x3d9   : > { %v4563_v7 = vpop.eup %4562  ;;  %v2429_v15 = vadd.f32 %v4561_v2, %v2428_v6  ;;  %v2395_v46 = vadd.f32 %v2394_v4, %v2393_v31  ;;  %v2130_v55 = vmul.f32 1.442695, %v2123_v11  ;;  %v2803_v11 = vld [vmem:[#allocation4 + $0x78] sm:$0xff] }
 0x3da   : > { %v4565_v37 = vpop.eup %4564  ;;  %4162 = vmatprep.subr.bf16.mxu1 %v4161_v38  ;;  %v2409_v1 = vadd.f32 %v4563_v7, %v2408_v9  ;;  %4578 = vpow2.f32 %v2126_v44 }
 0x3db   : > { %v4567_v35 = vpop.eup %4566  ;;  %4164 = vmatpush3.bf16.msra.mxu1 %v4161_v38  ;;  %v4133_v61 = vpack.c.bf16 %v4565_v37, %v4563_v7  ;;  %v2396_v26 = vrot.slane %v2395_v46, 1  ;;  %4580 = vpow2.f32 %v2128_v16  ;;  %v2351_v7 = vld [vmem:[#allocation3 + $0x3] sm:$0x1] }
 0x3dc   : > { %v4569_v23 = vpop.eup %4568  ;;  %v2410_v25 = vadd.f32 %v4565_v37, %v2409_v1  ;;  %v2430_v41 = vadd.f32 %v4567_v35, %v2429_v15  ;;  %4582 = vpow2.f32 %v2130_v55 }
 0x3dd   : > { %v4571_v32 = vpop.eup %4570  ;;  %4134 = vmatprep.subr.bf16.mxu0 %v4133_v61  ;;  %v4165_v57 = vpack.c.bf16 %v4569_v23, %v4567_v35  ;;  %v2397_v22 = vadd.f32 %v2396_v26, %v2395_v46  ;;  %v2788_v35 = vld [vmem:[#allocation4] sm:$0xff] }
 0x3de   : > { %v4573_v43 = vpop.eup %4572  ;;  %v2431_v5 = vadd.f32 %v4569_v23, %v2430_v41  ;;  %4136 = vmatpush3.bf16.msra.mxu0 %v4133_v61  ;;  %v2411_v42 = vadd.f32 %v4571_v32, %v2410_v25  ;;  %v2793_v61 = vld [vmem:[#allocation4 + $0x28] sm:$0xff]  ;;  %v2829_v23 = vmul.f32 %v2811_v28, %v2789_v40  ;;  %v2792_v25 = vld [vmem:[#allocation4 + $0x20] sm:$0xff]  ;;  %v2828_v41 = vmul.f32 %v2811_v28, %v2788_v35 }
 0x3df   : > { %v4575_v29 = vpop.eup %4574  ;;  %4166 = vmatprep.subr.bf16.mxu1 %v4165_v57  ;;  %v4137_v62 = vpack.c.bf16 %v4573_v43, %v4571_v32  ;;  %v2791_v32 = vld [vmem:[#allocation4 + $0x18] sm:$0xff] }
 0x3e0   : > { %v4577_v56 = vpop.eup %4576  ;;  %4168 = vmatpush3.bf16.msra.mxu1 %v4165_v57  ;;  %v2412_v17 = vadd.f32 %v4573_v43, %v2411_v42  ;;  %v2432_v63 = vadd.f32 %v4575_v29, %v2431_v5  ;;  %v2790_v43 = vld [vmem:[#allocation4 + $0x10] sm:$0xff] }
 0x3e1   : > { %4138 = vmatprep.subr.bf16.mxu0 %v4137_v62  ;;  %v4169_v12 = vpack.c.bf16 %v4577_v56, %v4575_v29  ;;  %v2795_v29 = vld [vmem:[#allocation4 + $0x38] sm:$0xff] }
 0x3e2   : > { %v2433_v3 = vadd.f32 %v4577_v56, %v2432_v63  ;;  %4140 = vmatpush3.bf16.msra.mxu0 %v4137_v62  ;;  %v2413_v27 = vrot.slane %v2412_v17, 4  ;;  %v2794_v63 = vld [vmem:[#allocation4 + $0x30] sm:$0xff] }
 0x3e3   : > { %4170 = vmatprep.subr.bf16.mxu1 %v4169_v12 }
 0x3e4   : > { %4172 = vmatpush3.bf16.msra.mxu1 %v4169_v12  ;;  %v4579_v50 = vpop.eup %4578  ;;  %v2414_v13 = vadd.f32 %v2413_v27, %v2412_v17  ;;  %v2434_v39 = vrot.slane %v2433_v3, 4  ;;  %v2831_v17 = vmul.f32 %v2811_v28, %v2791_v32 }
 0x3e5   : > { %3842 = vmatmul.mubr.f32.vlgmr.msra.gmra.mrb[4].mxu0 %v6054_v58  ;;  %v2353_v52 = vmul.f32 %v4579_v50, %v2349_v8  ;;  %v4581_v34 = vpop.eup %4580  ;;  %v2815_v1 = vrot.slane %v4579_v50, %v5565_v45  ;;  %v2797_v50 = vld [vmem:[#allocation4 + $0x48] sm:$0xff]  ;;  %v2796_v8 = vld [vmem:[#allocation4 + $0x40] sm:$0xff] }
 0x3e6   : > { %3844 = vmatprep.mubr.f32.mxu0 %v6055_v48  ;;  %v2415_v47 = vrot.slane %v2414_v13, 2  ;;  %v2435_v36 = vadd.f32 %v2434_v39, %v2433_v3  ;;  %v2354_v10 = vmul.f32 %v4581_v34, %v2350_v19  ;;  %v4583_v38 = vpop.eup %4582  ;;  %v2830_v3 = vmul.f32 %v2811_v28, %v2790_v43 }
 0x3e7   : > { %3880 = vmatmul.mubr.f32.vlgmr.msra.gmra.mrb[4].mxu1 %v6056_v33  ;;  %v2441_v53 = vadd.f32 %v2397_v22, %v2353_v52  ;;  %v2355_v15 = vmul.f32 %v4583_v38, %v2351_v7  ;;  %v2833_v57 = vmul.f32 %v2815_v1, %v2793_v61  ;;  %v2832_v42 = vmul.f32 %v2815_v1, %v2792_v25  ;;  %v2801_v52 = vld [vmem:[#allocation4 + $0x68] sm:$0xff] }
 0x3e8   : > { %3882 = vmatprep.mubr.f32.mxu1 %v6057_v54  ;;  %v2416_v18 = vadd.f32 %v2415_v47, %v2414_v13  ;;  %v2436_v2 = vrot.slane %v2435_v36, 2  ;;  %v2835_v33 = vmul.f32 %v2815_v1, %v2795_v29  ;;  %v2819_v22 = vrot.slane %v4581_v34, %v5565_v45  ;;  %v2800_v13 = vld [vmem:[#allocation4 + $0x60] sm:$0xff]  ;;  %v2799_v47 = vld [vmem:[#allocation4 + $0x58] sm:$0xff] }
 0x3e9   : > { %3845 = vmatmul.mubr.f32.gmra.mrb[6].mxu0 %v6058_v21  ;;  %2445 = vst [vmem:[#allocation3 + $0x1] sm:$0x1] %v2441_v53  ;;  %v2823_v27 = vrot.slane %v4583_v38, %v5565_v45 }
 0x3ea   : > { %v2417_v49 = vrot.slane %v2416_v18, 1  ;;  %v2437_v0 = vadd.f32 %v2436_v2, %v2435_v36  ;;  %v2837_v53 = vmul.f32 %v2819_v22, %v2797_v50  ;;  %v2836_v51 = vmul.f32 %v2819_v22, %v2796_v8 }
 0x3eb   : > { %3883 = vmatmul.mubr.f32.gmra.mrb[6].mxu1 %v6059_v59  ;;  %v2834_v59 = vmul.f32 %v2815_v1, %v2794_v63  ;;  %v2841_v16 = vmul.f32 %v2823_v27, %v2801_v52 }
 0x3ec   : > { %v2418_v20 = vadd.f32 %v2417_v49, %v2416_v18  ;;  %v2438_v60 = vrot.slane %v2437_v0, 1  ;;  %v2798_v18 = vld [vmem:[#allocation4 + $0x50] sm:$0xff]  ;;  %v2840_v49 = vmul.f32 %v2823_v27, %v2800_v13 }
 0x3ed   : > { %v2838_v2 = vmul.f32 %v2819_v22, %v2798_v18 }
 0x3ee   : > { %v2442_v9 = vadd.f32 %v2418_v20, %v2354_v10  ;;  %v2439_v6 = vadd.f32 %v2438_v60, %v2437_v0  ;;  %v2839_v20 = vmul.f32 %v2819_v22, %v2799_v47  ;;  %v2802_v10 = vld [vmem:[#allocation4 + $0x70] sm:$0xff]  ;;  %v2843_v0 = vmul.f32 %v2823_v27, %v2803_v11 }
 0x3ef   : > { %v2842_v38 = vmul.f32 %v2823_v27, %v2802_v10 }
 0x3f0   : > { %2446 = vst [vmem:[#allocation3 + $0x2] sm:$0x1] %v2442_v9  ;;  %v2443_v37 = vadd.f32 %v2439_v6, %v2355_v15 }
 0x3f2   : > { %2447 = vst [vmem:[#allocation3 + $0x3] sm:$0x1] %v2443_v37 }
 0x495   : > { %v3767_v5 = vpop.f32.mrb[0].mxu0 }
 0x496   : > { %v2845_v62 = vadd.f32 %v3767_v5, %v2829_v23  ;;  %v2514_v56 = vpop.f32.mrb[1].mxu0 }
 0x497   : > { %v3805_v12 = vpop.f32.mrb[0].mxu1  ;;  %v2844_v14 = vadd.f32 %v2828_v41, %v2514_v56 }
 0x498   : > { %2861 = vst [vmem:[#allocation4 + $0x8] sm:$0xff] %v2845_v62  ;;  %v2849_v58 = vadd.f32 %v3805_v12, %v2833_v57  ;;  %v2599_v48 = vpop.f32.mrb[1].mxu1 }
 0x499   : > { %2860 = vst [vmem:[#allocation4] sm:$0xff] %v2844_v14  ;;  %v2848_v54 = vadd.f32 %v2832_v42, %v2599_v48  ;;  %v3770_v21 = vpop.f32.mrb[2].mxu0 }
 0x49a   : > { %2865 = vst [vmem:[#allocation4 + $0x28] sm:$0xff] %v2849_v58  ;;  %v2847_v24 = vadd.f32 %v3770_v21, %v2831_v17  ;;  %v2524_v31 = vpop.f32.mrb[3].mxu0 }
 0x49b   : > { %2864 = vst [vmem:[#allocation4 + $0x20] sm:$0xff] %v2848_v54  ;;  %v3808_v30 = vpop.f32.mrb[2].mxu1  ;;  %v2846_v4 = vadd.f32 %v2830_v3, %v2524_v31 }
 0x49c   : > { %2863 = vst [vmem:[#allocation4 + $0x18] sm:$0xff] %v2847_v24  ;;  %v2851_v44 = vadd.f32 %v3808_v30, %v2835_v33  ;;  %v2609_v46 = vpop.f32.mrb[3].mxu1 }
 0x49d   : > { %2862 = vst [vmem:[#allocation4 + $0x10] sm:$0xff] %v2846_v4  ;;  %v2850_v26 = vadd.f32 %v2834_v59, %v2609_v46 }
 0x49e   : > { %2867 = vst [vmem:[#allocation4 + $0x38] sm:$0xff] %v2851_v44 }
 0x49f   : > { %2866 = vst [vmem:[#allocation4 + $0x30] sm:$0xff] %v2850_v26 }
 0x4b8   : > { %v3843_v39 = vpop.f32.mrb[4].mxu0 }
 0x4b9   : > { %v2853_v36 = vadd.f32 %v3843_v39, %v2837_v53  ;;  %v2684_v19 = vpop.f32.mrb[5].mxu0 }
 0x4ba   : > { %v3881_v55 = vpop.f32.mrb[4].mxu1  ;;  %v2852_v34 = vadd.f32 %v2836_v51, %v2684_v19 }
 0x4bb   : > { %2869 = vst [vmem:[#allocation4 + $0x48] sm:$0xff] %v2853_v36  ;;  %v2857_v45 = vadd.f32 %v3881_v55, %v2841_v16  ;;  %v2769_v9 = vpop.f32.mrb[5].mxu1 }
 0x4bc   : > { %2868 = vst [vmem:[#allocation4 + $0x40] sm:$0xff] %v2852_v34  ;;  %v2856_v60 = vadd.f32 %v2840_v49, %v2769_v9  ;;  %v3846_v6 = vpop.f32.mrb[6].mxu0 }
 0x4bd   : > { %2873 = vst [vmem:[#allocation4 + $0x68] sm:$0xff] %v2857_v45  ;;  %v2855_v7 = vadd.f32 %v3846_v6, %v2839_v20  ;;  %v2694_v15 = vpop.f32.mrb[7].mxu0 }
 0x4be   : > { %2872 = vst [vmem:[#allocation4 + $0x60] sm:$0xff] %v2856_v60  ;;  %v3884_v37 = vpop.f32.mrb[6].mxu1  ;;  %v2854_v28 = vadd.f32 %v2838_v2, %v2694_v15 }
 0x4bf   : > { %2871 = vst [vmem:[#allocation4 + $0x58] sm:$0xff] %v2855_v7  ;;  %v2859_v40 = vadd.f32 %v3884_v37, %v2843_v0  ;;  %v2779_v1 = vpop.f32.mrb[7].mxu1 }
 0x4c0   : > { %2870 = vst [vmem:[#allocation4 + $0x50] sm:$0xff] %v2854_v28  ;;  %v2858_v35 = vadd.f32 %v2842_v38, %v2779_v1 }
 0x4c1   : > { %2875 = vst [vmem:[#allocation4 + $0x78] sm:$0xff] %v2859_v40 }
 0x4c2   : > { %2874 = vst [vmem:[#allocation4 + $0x70] sm:$0xff] %v2858_v35 }
 0x4c3 PF: > { %p3208_p11 = scmp.ne.s32.totalorder %s4702_s18, 1 }
 0x4c4   : > { %v2884_v61 = vld [vmem:[#allocation3] sm:$0x1] (!%p3208_p11)  ;;  %v2912_v23 = vlaneseq (!%p3208_p11)  ;;  %v2885_v25 = vld [vmem:[#allocation3 + $0x1] sm:$0x1] (!%p3208_p11)  ;;  %v2886_v41 = vld [vmem:[#allocation3 + $0x2] sm:$0x1] (!%p3208_p11) }
 0x4c5   : > { %2883 = sbr.rel (%p3208_p11) target bundleno = 1244 (0x4dc), region = 60  ;;  %4584 = vrcp.f32 (!%p3208_p11), %v2884_v61  ;;  %v2887_v57 = vld [vmem:[#allocation3 + $0x3] sm:$0x1] (!%p3208_p11)  ;;  %v2892_v5 = vld [vmem:[#allocation4] sm:$0xff] (!%p3208_p11)  ;;  %v2893_v42 = vld [vmem:[#allocation4 + $0x8] sm:$0xff] (!%p3208_p11) }
 0x4c6   : > { %4586 = vrcp.f32 (!%p3208_p11), %v2885_v25  ;;  %v2913_v32 = vshrl.u32 (!%p3208_p11), %v2912_v23, 7  ;;  %v2894_v62 = vld [vmem:[#allocation4 + $0x10] sm:$0xff] (!%p3208_p11)  ;;  %v2895_v56 = vld [vmem:[#allocation4 + $0x18] sm:$0xff] (!%p3208_p11)  ;;  %v2896_v17 = vld [vmem:[#allocation4 + $0x20] sm:$0xff] (!%p3208_p11) }
 0x4c7   : > { %4588 = vrcp.f32 (!%p3208_p11), %v2886_v41  ;;  %v2897_v14 = vld [vmem:[#allocation4 + $0x28] sm:$0xff] (!%p3208_p11)  ;;  %v2898_v3 = vld [vmem:[#allocation4 + $0x30] sm:$0xff] (!%p3208_p11)  ;;  %v2899_v58 = vld [vmem:[#allocation4 + $0x38] sm:$0xff] (!%p3208_p11) }
 0x4c8   : > { %4590 = vrcp.f32 (!%p3208_p11), %v2887_v57  ;;  %v2914_v43 = vsub.s32 (!%p3208_p11), 0, %v2913_v32  ;;  %v2900_v31 = vld [vmem:[#allocation4 + $0x40] sm:$0xff] (!%p3208_p11)  ;;  %v2901_v30 = vld [vmem:[#allocation4 + $0x48] sm:$0xff] (!%p3208_p11)  ;;  %v2902_v22 = vld [vmem:[#allocation4 + $0x50] sm:$0xff] (!%p3208_p11) }
 0x4c9   : > { %v2903_v50 = vld [vmem:[#allocation4 + $0x58] sm:$0xff] (!%p3208_p11)  ;;  %v2904_v27 = vld [vmem:[#allocation4 + $0x60] sm:$0xff] (!%p3208_p11)  ;;  %v2905_v53 = vld [vmem:[#allocation4 + $0x68] sm:$0xff] (!%p3208_p11) }
 0x4ca   : > { %v2906_v13 = vld [vmem:[#allocation4 + $0x70] sm:$0xff] (!%p3208_p11)  ;;  %v2907_v51 = vld [vmem:[#allocation4 + $0x78] sm:$0xff] (!%p3208_p11) }
 0x4cf   : > { %v4585_v29 = vpop.eup %4584 }
 0x4d0   : > { %v4587_v63 = vpop.eup %4586  ;;  %v2915_v12 = vrot.slane %v4585_v29, %v2914_v43 }
 0x4d1   : > { %v2919_v48 = vrot.slane %v4587_v63, %v2914_v43  ;;  %v4589_v33 = vpop.eup %4588 }
 0x4d2   : > { %v2932_v54 = vmul.f32 %v2915_v12, %v2892_v5  ;;  %v2933_v21 = vmul.f32 %v2915_v12, %v2893_v42  ;;  %v2934_v59 = vmul.f32 %v2915_v12, %v2894_v62  ;;  %v2935_v24 = vmul.f32 %v2915_v12, %v2895_v56  ;;  %v4591_v8 = vpop.eup %4590 }
 0x4d3   : > { %v2936_v4 = vmul.f32 %v2919_v48, %v2896_v17  ;;  %v2937_v44 = vmul.f32 %v2919_v48, %v2897_v14  ;;  %v2938_v46 = vmul.f32 %v2919_v48, %v2898_v3  ;;  %v2939_v26 = vmul.f32 %v2919_v48, %v2899_v58 }
 0x4d4   : > { %2948 = vst [vmem:[%s4988_s7] sm:$0xff] %v2932_v54  ;;  %2949 = vst [vmem:[%s4988_s7 + $0x8] sm:$0xff] %v2933_v21  ;;  %v2923_v52 = vrot.slane %v4589_v33, %v2914_v43  ;;  %v2927_v47 = vrot.slane %v4591_v8, %v2914_v43 }
 0x4d5   : > { %2950 = vst [vmem:[%s4988_s7 + $0x10] sm:$0xff] %v2934_v59  ;;  %2951 = vst [vmem:[%s4988_s7 + $0x18] sm:$0xff] %v2935_v24 }
 0x4d6   : > { %2952 = vst [vmem:[%s4988_s7 + $0x20] sm:$0xff] %v2936_v4  ;;  %2953 = vst [vmem:[%s4988_s7 + $0x28] sm:$0xff] %v2937_v44  ;;  %v2940_v16 = vmul.f32 %v2923_v52, %v2900_v31  ;;  %v2941_v18 = vmul.f32 %v2923_v52, %v2901_v30  ;;  %v2942_v39 = vmul.f32 %v2923_v52, %v2902_v22 }
 0x4d7   : > { %2954 = vst [vmem:[%s4988_s7 + $0x30] sm:$0xff] %v2938_v46  ;;  %2955 = vst [vmem:[%s4988_s7 + $0x38] sm:$0xff] %v2939_v26  ;;  %v2943_v49 = vmul.f32 %v2923_v52, %v2903_v50  ;;  %v2944_v11 = vmul.f32 %v2927_v47, %v2904_v27  ;;  %v2945_v36 = vmul.f32 %v2927_v47, %v2905_v53 }
 0x4d8   : > { %v2946_v19 = vmul.f32 %v2927_v47, %v2906_v13  ;;  %v2947_v20 = vmul.f32 %v2927_v47, %v2907_v51  ;;  %2956 = vst [vmem:[%s4988_s7 + $0x40] sm:$0xff] %v2940_v16  ;;  %2957 = vst [vmem:[%s4988_s7 + $0x48] sm:$0xff] %v2941_v18 }
 0x4d9   : > { %2958 = vst [vmem:[%s4988_s7 + $0x50] sm:$0xff] %v2942_v39  ;;  %2959 = vst [vmem:[%s4988_s7 + $0x58] sm:$0xff] %v2943_v49 }
 0x4da   : > { %2960 = vst [vmem:[%s4988_s7 + $0x60] sm:$0xff] %v2944_v11  ;;  %2961 = vst [vmem:[%s4988_s7 + $0x68] sm:$0xff] %v2945_v36 }
 0x4db   : > { %2962 = vst [vmem:[%s4988_s7 + $0x70] sm:$0xff] %v2946_v19  ;;  %2963 = vst [vmem:[%s4988_s7 + $0x78] sm:$0xff] %v2947_v20 }
 0x4dc PF: > { %s3210_s18 = sshll.u32 %s4706_s19, 7  ;;  %s2980_s6 = sshll.u32 %s4988_s7, 4  ;;  %s5791_s6 = int_to_ptr.vmem [resolvable:$true] %s2980_s6 }
 0x4dd   : > { %s5788_s9 = scalar_lea.hbm %s5857_s3, %s3210_s18  ;;  %s2965_s11 = scalar_lea.sflag [#allocation8], %s4968_s30 }
 0x4de   : > { %s4592_s12 = scalar_lea.vmem %s5791_s6, 2048  ;;  %s4741_s0 = smov [#allocation12]  }
 0x4df   : > { %p4593_p12 = scmp.ne.s32.totalorder %s5791_s6, %s4592_s12  ;;  %s4596_s25 = sshll.u32 %s4741_s0, 4  ;;  %s4597_s25 = int_to_ptr.vmem [resolvable:$false] %s4596_s25 }
 0x4e0   : > { %s4598_s19 = scalar_lea.vmem %s4597_s25, 4096  ;;  %p4599_p5 = scmp.lt.s32.totalorder %s5791_s6, %s4597_s25 }
 0x4e1   : > { %p4594_p13 = pnand %p4593_p12, %p4887_p4  ;;  %p4600_p8 = scmp.lt.s32.totalorder %s4598_s19, %s4592_s12 }
 0x4e3   : > { %p4595_p0 = pneg %p4594_p13  ;;  %p4601_p2 = por %p4600_p8, %p4599_p5 }
 0x4e5   : > { %p4602_p1 = pnand %p4601_p2, %p4595_p0 }
 0x4e7   : > { %4605 = shalt.err (!%p4602_p1)
}
 0x4e8   : > { %s4606_s26 = scalar_lea.hbm %s5788_s9, 2048  ;;  %s4610_s27 = scalar_lea.hbm %s5857_s3, 4096 }
 0x4e9   : > { %p4607_p3 = scmp.ne.s32.totalorder %s5788_s9, %s4606_s26  ;;  %p4611_p9 = scmp.lt.u32.totalorder %s5788_s9, %s5857_s3 }
 0x4ea   : > { %p4612_p11 = scmp.lt.u32.totalorder %s4610_s27, %s4606_s26  ;;  %p4614_p13 = scmp.lt.u32.totalorder %s4606_s26, %s5788_s9 }
 0x4eb   : > { %p4608_p6 = pnand %p4607_p3, %p4887_p4 }
 0x4ec   : > { %p4613_p12 = por %p4612_p11, %p4611_p9 }
 0x4ed   : > { %p4609_p7 = pneg %p4608_p6 }
 0x4ee   : > { %p4615_p0 = por %p4614_p13, %p4613_p12 }
 0x4f0   : > { %p4616_p5 = pnand %p4615_p0, %p4609_p7 }
 0x4f2   : > { %4619 = shalt.err (!%p4616_p5)
}
 0x4f3   : > { %s4742_s21 = smov 128   ;;  %s4743_s24 = smov 256  }
 0x4f4   : > { %s4744_s1 = smov 8  }
 0x4f5   : > { %4200 = dma.vmem_to_hbm [thread:$0]  (%p4887_p4), %s5791_s6, 2048, %s5788_s9, %s2965_s11, %s4742_s21, %s4743_s24, %s4744_s1  }
 0x4f6 PF: > { %p4206_p8 = scmp.ge.s32.totalorder %s4718_s22, 2  ;;  %s2995_s7 = sand.u32 1, %s4690_s15  }
 0x4f7   : > { %s2996_s18 = scalar_lea.sflag [#allocation8], %s2995_s7 }
 0x4f8   : > { %p4203_p2 = pnand %p4206_p8, %p4894_p10 }
 0x4fa   : > { %4673 = dma.done.wait (!%p4203_p2), %s2996_s18, 2048  }
 0x4fb   : > { %4675 = vsyncadd (!%p4203_p2), %s2996_s18, 4294965248  ;;  %s22_s22 = sadd.s32 1, %s4718_s22   ;;  %s6061_s23 = sld [smem:[#allocation29_spill]] }
 0x4fc   : > { %p19_p1 = scmp.ge.s32.totalorder %s22_s22, 6   ;;  %s6062_s10 = sld [smem:[#allocation25_spill]] }
 0x4fd   : > { %s6063_s17 = sld [smem:[#allocation30_spill]]  ;;  %s6064_s19 = sld [smem:[#allocation26_spill]] }
 0x4fe   : > { %s6065_s30 = sld [smem:[#allocation27_spill]]  ;;  %s6066_s21 = sld [smem:[#allocation28_spill]] }
 0x4ff   : > { %s6067_s12 = smov %s4682_s13  ;;  %s6068_s13 = smov %s4686_s14 }
 0x500   : > { %s6070_s15 = smov %s4694_s16  ;;  %s6072_s18 = smov %s4710_s20 }
 0x501   : > { %s6069_s14 = smov %s6061_s23  ;;  %21 = sbr.rel (!%p19_p1) target bundleno = 14 (0xe), region = 132 }
 0x502   : > { %s6071_s16 = smov %s6062_s10 }
 0x504   : > { %s6073_s20 = smov %s6065_s30 }
 0x508   :  { %3001 = vsyncpa [#allocation7], 1 }
 0x509   :  { %3003 = vsyncpa [#allocation7 + $0x1], 1 }
 0x50a   :  { %3004 = vsyncpa [#allocation10], 1 }
 0x50b   :  { %3006 = vsyncpa [#allocation10 + $0x1], 1 }
 0x50c   :  { %3007 = vsyncpa [#allocation8], 1 }
 0x50d   :  { %3009 = vsyncpa [#allocation8 + $0x1], 1 }

</bundles_post_ra>
